<compile_context>
chip_gen: v7x
topology: tpu7x:2x2x1
jax: 0.10.0
libtpu: 0.0.40
codegen_flags: <defaults>
</compile_context>

<pallas_src>
import functools

import jax
import jax.numpy as jnp
from jax.experimental import pallas as pl
from jax.experimental.pallas import tpu as pltpu

BN_EPS = 1e-5


def fold_bn(gamma, beta, mean, var):
    scale = gamma / jnp.sqrt(var + BN_EPS)
    shift = beta - mean * scale
    return scale, shift


def _mm(a, b, mm_dtype):
    """Matmul with optional low-precision operands, f32 accumulation."""
    if mm_dtype is not None:
        a = a.astype(mm_dtype)
        b = b.astype(mm_dtype)
    return jnp.dot(a, b, preferred_element_type=jnp.float32)


def _dw_tap_masks(h, w, k):
    """(k*k, H*W) 0/1 masks marking which output pixels have a valid input for each tap."""
    p = k // 2
    hh, ww = jnp.meshgrid(jnp.arange(h), jnp.arange(w), indexing="ij")
    masks = []
    for kh in range(k):
        for kw in range(k):
            valid = ((hh + kh - p >= 0) & (hh + kh - p < h) &
                     (ww + kw - p >= 0) & (ww + kw - p < w))
            masks.append(valid.reshape(-1))
    return jnp.stack(masks).astype(jnp.float32)


def _subsample_matrix(h, w, stride):
    """(H*W, Hout*Wout) selection matrix: one matmul replaces strided spatial slicing."""
    h_out = (h - 1) // stride + 1
    w_out = (w - 1) // stride + 1
    rows = (jnp.arange(h_out)[:, None] * stride * w
            + jnp.arange(w_out)[None, :] * stride).reshape(-1)
    cols = jnp.arange(h_out * w_out)
    sel = jnp.zeros((h * w, h_out * w_out), jnp.float32)
    return sel.at[rows, cols].set(1.0)


# ---------------- fully fused MBConv kernel (one grid step per image) ----------------
def _mbconv_kernel(*refs, k, H, W, stride, has_expand, use_residual, mm_dtype):
    it = iter(refs)
    x_ref = next(it)
    if has_expand:
        exp_wt_ref, exp_sc_ref, exp_sh_ref = next(it), next(it), next(it)
    dw_wt_ref, dw_mask_ref, dw_sc_ref, dw_sh_ref = next(it), next(it), next(it), next(it)
    sub_sel_ref = next(it) if stride != 1 else None
    se_w1t_ref, se_b1_ref, se_w2t_ref, se_b2_ref = next(it), next(it), next(it), next(it)
    proj_wt_ref, proj_sc_ref, proj_sh_ref = next(it), next(it), next(it)
    out_ref = next(it)

    hw = H * W
    p = k // 2
    x = x_ref[0].astype(jnp.float32)                        # (Cin, H*W); lanes = H*W

    # ---- 1x1 expand conv + folded BN + ReLU (channel-major matmul) ----
    if has_expand:
        y = _mm(exp_wt_ref[...], x, mm_dtype)                # (Cexp, H*W)
        y = jnp.maximum(y * exp_sc_ref[...] + exp_sh_ref[...], 0.0)
    else:
        y = x

    # ---- kxk depthwise conv + folded BN + ReLU ----
    # Each tap is a constant shift of the flattened spatial axis: XLU roll + 0/1 border
    # mask (no strided slices, no per-tap relayouts of the padded image).
    dw_w = dw_wt_ref[...].astype(jnp.float32)                # (Cexp, k*k)
    dw_m = dw_mask_ref[...]                                  # (k*k, H*W)
    acc = jnp.zeros_like(y)
    for kh in range(k):
        for kw in range(k):
            t = kh * k + kw
            w_t = dw_w[:, t:t + 1]                           # (Cexp, 1)
            off = (kh - p) * W + (kw - p)
            if off == 0:                                     # centre tap: no shift/mask
                acc = acc + y * w_t
            else:
                shifted = pltpu.roll(y, (-off) % hw, 1)      # out[:, j] = y[:, j + off]
                acc = acc + (shifted * w_t) * dw_m[t:t + 1, :]
    acc = jnp.maximum(acc * dw_sc_ref[...] + dw_sh_ref[...], 0.0)    # (Cexp, H*W)

    # stride > 1: subsample once via a selection matmul (exact, lane-dense)
    if stride != 1:
        acc = jnp.dot(acc, sub_sel_ref[...], preferred_element_type=jnp.float32)

    # ---- SqueezeExcitation: global pool + fc1 ReLU + fc2 sigmoid, all VMEM-resident ----
    pooled = jnp.mean(acc, axis=1, keepdims=True)                            # (Cexp, 1)
    s1 = jnp.maximum(_mm(se_w1t_ref[...], pooled, mm_dtype) + se_b1_ref[...], 0.0)
    s2 = jax.nn.sigmoid(_mm(se_w2t_ref[...], s1, mm_dtype) + se_b2_ref[...])  # (Cexp, 1)
    y_se = acc * s2

    # ---- 1x1 project conv + folded BN (+ fused residual) ----
    out = _mm(proj_wt_ref[...], y_se, mm_dtype)                              # (Cout, HWout)
    out = out * proj_sc_ref[...] + proj_sh_ref[...]
    if use_residual:
        out = out + x
    out_ref[0] = out.astype(out_ref.dtype)


# ---------------- wrapper: NCHW in, NCHW out, single pallas_call ----------------
def mbconv_forward(x_nchw, params, *, expand_ratio, stride, kernel_size, matmul_dtype=None):
    n, cin, h, w = x_nchw.shape
    k = kernel_size
    hw = h * w
    cout = params["proj_w"].shape[1]
    cexp = params["dw_w"].shape[-1]
    csq = params["se_w1"].shape[1]
    has_expand = expand_ratio != 1
    use_residual = (stride == 1) and (cin == cout)
    h_out = (h - 1) // stride + 1
    w_out = (w - 1) // stride + 1
    hw_out = h_out * w_out

    # NCHW -> (N, C, H*W) is a free reshape; lane axis = H*W (lane-dense everywhere).
    x2 = x_nchw.reshape(n, cin, hw)

    args = [x2]
    in_specs = [pl.BlockSpec((1, cin, hw), lambda i: (i, 0, 0))]

    def full(arr):
        args.append(arr)
        nd = arr.ndim
        in_specs.append(pl.BlockSpec(arr.shape, lambda i, nd=nd: (0,) * nd))

    if has_expand:
        es, eb = fold_bn(*params["exp_bn"])
        full(params["exp_w"].T)                       # (Cexp, Cin)
        full(es.reshape(cexp, 1))
        full(eb.reshape(cexp, 1))
    ds_, db = fold_bn(*params["dw_bn"])
    full(params["dw_w"].reshape(k * k, cexp).T)       # (Cexp, k*k), tap-major columns
    full(_dw_tap_masks(h, w, k))                      # (k*k, H*W)
    full(ds_.reshape(cexp, 1))
    full(db.reshape(cexp, 1))
    if stride != 1:
        full(_subsample_matrix(h, w, stride))         # (H*W, Hout*Wout)
    full(params["se_w1"].T)                           # (Csq, Cexp)
    full(params["se_b1"].reshape(csq, 1))
    full(params["se_w2"].T)                           # (Cexp, Csq)
    full(params["se_b2"].reshape(cexp, 1))
    ps, pb = fold_bn(*params["proj_bn"])
    full(params["proj_w"].T)                          # (Cout, Cexp)
    full(ps.reshape(cout, 1))
    full(pb.reshape(cout, 1))

    kernel = functools.partial(
        _mbconv_kernel, k=k, H=h, W=w, stride=stride,
        has_expand=has_expand, use_residual=use_residual, mm_dtype=matmul_dtype)

    flops = 2 * n * hw * k * k * cexp + 2 * n * hw_out * cexp * cout
    if has_expand:
        flops += 2 * n * hw * cin * cexp
    flops += 4 * n * cexp * csq
    if stride != 1:
        flops += 2 * n * cexp * hw * hw_out
    bytes_accessed = 4 * (int(x2.size) + sum(int(a.size) for a in args[1:])
                          + n * cout * hw_out)

    out = pl.pallas_call(
        kernel,
        out_shape=jax.ShapeDtypeStruct((n, cout, hw_out), x_nchw.dtype),
        grid=(n,),
        in_specs=in_specs,
        out_specs=pl.BlockSpec((1, cout, hw_out), lambda i: (i, 0, 0)),
        compiler_params=pltpu.CompilerParams(
            dimension_semantics=("parallel",),
            vmem_limit_bytes=32 * 1024 * 1024),
        cost_estimate=pl.CostEstimate(
            flops=flops, transcendentals=n * cexp, bytes_accessed=bytes_accessed),
    )(*args)
    return out.reshape(n, cout, h_out, w_out)


# ---------------- pure-JAX reference (for correctness check) ----------------
def mbconv_reference(x_nchw, params, *, expand_ratio, stride, kernel_size):
    x = jnp.transpose(x_nchw, (0, 2, 3, 1))
    n, h, w, cin = x.shape
    cout = params["proj_w"].shape[1]
    use_residual = (stride == 1) and (cin == cout)
    y = x
    if expand_ratio != 1:
        s, b = fold_bn(*params["exp_bn"])
        y = jnp.maximum(jnp.einsum("nhwi,io->nhwo", y, params["exp_w"]) * s + b, 0.0)
    cexp = y.shape[-1]
    k, p = kernel_size, kernel_size // 2
    rhs = params["dw_w"].reshape(k, k, 1, cexp)
    s, b = fold_bn(*params["dw_bn"])
    y = jax.lax.conv_general_dilated(y, rhs, (stride, stride), [(p, p), (p, p)],
                                     dimension_numbers=("NHWC", "HWIO", "NHWC"),
                                     feature_group_count=cexp)
    y = jnp.maximum(y * s + b, 0.0)
    xm = jnp.mean(y, axis=(1, 2))
    sc = jnp.maximum(xm @ params["se_w1"] + params["se_b1"], 0.0)
    sc = jax.nn.sigmoid(sc @ params["se_w2"] + params["se_b2"])
    y = y * sc[:, None, None, :]
    s, b = fold_bn(*params["proj_bn"])
    y = jnp.einsum("nhwi,io->nhwo", y, params["proj_w"]) * s + b
    if use_residual:
        y = y + x
    return jnp.transpose(y, (0, 3, 1, 2))


# ---------------- deterministic parameter initialization ----------------
def init_params(key, cin, cout, expand_ratio, kernel_size):
    cexp = cin * expand_ratio
    csq = cexp // 4
    keys = jax.random.split(key, 16)

    def bn(kg, kb, km, kv, c):
        gamma = 1.0 + 0.1 * jax.random.normal(kg, (c,), jnp.float32)
        beta = 0.1 * jax.random.normal(kb, (c,), jnp.float32)
        mean = 0.1 * jax.random.normal(km, (c,), jnp.float32)
        var = jax.random.uniform(kv, (c,), jnp.float32, 0.5, 1.5)
        return gamma, beta, mean, var

    params = {}
    if expand_ratio != 1:
        params["exp_w"] = 0.3 * jax.random.normal(keys[0], (cin, cexp), jnp.float32)
        params["exp_bn"] = bn(keys[1], keys[2], keys[3], keys[4], cexp)
    params["dw_w"] = 0.3 * jax.random.normal(keys[5], (kernel_size, kernel_size, cexp), jnp.float32)
    params["dw_bn"] = bn(keys[6], keys[7], keys[8], keys[9], cexp)
    params["se_w1"] = 0.3 * jax.random.normal(keys[10], (cexp, csq), jnp.float32)
    params["se_b1"] = 0.1 * jax.random.normal(keys[11], (csq,), jnp.float32)
    params["se_w2"] = 0.3 * jax.random.normal(keys[12], (csq, cexp), jnp.float32)
    params["se_b2"] = 0.1 * jax.random.normal(keys[13], (cexp,), jnp.float32)
    params["proj_w"] = 0.3 * jax.random.normal(keys[14], (cexp, cout), jnp.float32)
    params["proj_bn"] = bn(*jax.random.split(keys[15], 4), cout)
    return params


if __name__ == "__main__":
    key = jax.random.PRNGKey(0)

    configs = [
        # (N, Cin, H, W, Cout, expand_ratio, stride, kernel_size)
        (2, 8, 16, 16, 8, 4, 1, 3),     # residual path (stride 1, Cin == Cout)
        (2, 8, 16, 16, 16, 6, 2, 5),    # strided path, larger kernel, no residual
    ]
    for cfg_i, (N, Cin, H, W, Cout, er, st, ks) in enumerate(configs):
        kx, kp, key = jax.random.split(key, 3)
        x = jax.random.normal(kx, (N, Cin, H, W), jnp.float32)
        params = init_params(kp, Cin, Cout, er, ks)

        out = mbconv_forward(x, params, expand_ratio=er, stride=st, kernel_size=ks)
        out = jax.block_until_ready(out)
        h_out = (H - 1) // st + 1
        w_out = (W - 1) // st + 1
        assert out.shape == (N, Cout, h_out, w_out), out.shape

        ref = mbconv_reference(x, params, expand_ratio=er, stride=st, kernel_size=ks)
        if not jnp.allclose(out, ref, atol=2e-2, rtol=2e-2):
            raise AssertionError(
                f"config {cfg_i}: max abs diff {float(jnp.max(jnp.abs(out - ref)))}")

    print("KERNEL_OK")
</pallas_src>

<mosaic_0001>
module attributes {stable_mosaic.version = 11 : i64} {
  func.func @_mbconv_kernel(%arg0: i32, %arg1: memref<1x8x256xf32, #tpu.memory_space<vmem>>, %arg2: memref<32x8xf32, #tpu.memory_space<vmem>>, %arg3: memref<32x1xf32, #tpu.memory_space<vmem>>, %arg4: memref<32x1xf32, #tpu.memory_space<vmem>>, %arg5: memref<32x9xf32, #tpu.memory_space<vmem>>, %arg6: memref<9x256xf32, #tpu.memory_space<vmem>>, %arg7: memref<32x1xf32, #tpu.memory_space<vmem>>, %arg8: memref<32x1xf32, #tpu.memory_space<vmem>>, %arg9: memref<8x32xf32, #tpu.memory_space<vmem>>, %arg10: memref<8x1xf32, #tpu.memory_space<vmem>>, %arg11: memref<32x8xf32, #tpu.memory_space<vmem>>, %arg12: memref<32x1xf32, #tpu.memory_space<vmem>>, %arg13: memref<8x32xf32, #tpu.memory_space<vmem>>, %arg14: memref<8x1xf32, #tpu.memory_space<vmem>>, %arg15: memref<8x1xf32, #tpu.memory_space<vmem>>, %arg16: memref<1x8x256xf32, #tpu.memory_space<vmem>>) attributes {dimension_semantics = [#tpu.dimension_semantics<parallel>], iteration_bounds = array<i64: 2>, scalar_prefetch = 0 : i64, scratch_operands = 0 : i64, tpu.core_type = #tpu.core_type<tc>, window_params = [{transform_indices = @transform_0, window_bounds = array<i64: 1, 8, 256>}, {pipeline_mode = #tpu.pipeline_mode<synchronous>, transform_indices = @transform_1, window_bounds = array<i64: 32, 8>}, {pipeline_mode = #tpu.pipeline_mode<synchronous>, transform_indices = @transform_2, window_bounds = array<i64: 32, 1>}, {pipeline_mode = #tpu.pipeline_mode<synchronous>, transform_indices = @transform_3, window_bounds = array<i64: 32, 1>}, {pipeline_mode = #tpu.pipeline_mode<synchronous>, transform_indices = @transform_4, window_bounds = array<i64: 32, 9>}, {pipeline_mode = #tpu.pipeline_mode<synchronous>, transform_indices = @transform_5, window_bounds = array<i64: 9, 256>}, {pipeline_mode = #tpu.pipeline_mode<synchronous>, transform_indices = @transform_6, window_bounds = array<i64: 32, 1>}, {pipeline_mode = #tpu.pipeline_mode<synchronous>, transform_indices = @transform_7, window_bounds = array<i64: 32, 1>}, {pipeline_mode = #tpu.pipeline_mode<synchronous>, transform_indices = @transform_8, window_bounds = array<i64: 8, 32>}, {pipeline_mode = #tpu.pipeline_mode<synchronous>, transform_indices = @transform_9, window_bounds = array<i64: 8, 1>}, {pipeline_mode = #tpu.pipeline_mode<synchronous>, transform_indices = @transform_10, window_bounds = array<i64: 32, 8>}, {pipeline_mode = #tpu.pipeline_mode<synchronous>, transform_indices = @transform_11, window_bounds = array<i64: 32, 1>}, {pipeline_mode = #tpu.pipeline_mode<synchronous>, transform_indices = @transform_12, window_bounds = array<i64: 8, 32>}, {pipeline_mode = #tpu.pipeline_mode<synchronous>, transform_indices = @transform_13, window_bounds = array<i64: 8, 1>}, {pipeline_mode = #tpu.pipeline_mode<synchronous>, transform_indices = @transform_14, window_bounds = array<i64: 8, 1>}, {transform_indices = @transform_15, window_bounds = array<i64: 1, 8, 256>}]} {
    %c0 = arith.constant 0 : index
    %c0_0 = arith.constant 0 : index
    %c0_1 = arith.constant 0 : index
    %0 = vector.load %arg1[%c0, %c0_0, %c0_1] : memref<1x8x256xf32, #tpu.memory_space<vmem>>, vector<1x8x256xf32>
    %1 = vector.shape_cast %0 : vector<1x8x256xf32> to vector<8x256xf32>
    %c0_2 = arith.constant 0 : index
    %c0_3 = arith.constant 0 : index
    %2 = vector.load %arg2[%c0_2, %c0_3] : memref<32x8xf32, #tpu.memory_space<vmem>>, vector<32x8xf32>
    %cst = arith.constant dense<0.000000e+00> : vector<32x256xf32>
    %3 = tpu.matmul %2, %1, %cst {dimension_numbers = #tpu.dot_dimension_numbers<[1], [0], [0], [1], [0, 0, 1, 1], [], []>} : vector<32x8xf32>, vector<8x256xf32>, vector<32x256xf32> -> vector<32x256xf32>
    %c0_4 = arith.constant 0 : index
    %c0_5 = arith.constant 0 : index
    %4 = vector.load %arg3[%c0_4, %c0_5] : memref<32x1xf32, #tpu.memory_space<vmem>>, vector<32x1xf32>
    %5 = vector.broadcast %4 : vector<32x1xf32> to vector<32x256xf32>
    %6 = arith.mulf %3, %5 : vector<32x256xf32>
    %c0_6 = arith.constant 0 : index
    %c0_7 = arith.constant 0 : index
    %7 = vector.load %arg4[%c0_6, %c0_7] : memref<32x1xf32, #tpu.memory_space<vmem>>, vector<32x1xf32>
    %8 = vector.broadcast %7 : vector<32x1xf32> to vector<32x256xf32>
    %9 = arith.addf %6, %8 : vector<32x256xf32>
    %cst_8 = arith.constant 0.000000e+00 : f32
    %10 = vector.broadcast %cst_8 : f32 to vector<32x256xf32>
    %11 = arith.maximumf %9, %10 : vector<32x256xf32>
    %c0_9 = arith.constant 0 : index
    %c0_10 = arith.constant 0 : index
    %12 = vector.load %arg5[%c0_9, %c0_10] : memref<32x9xf32, #tpu.memory_space<vmem>>, vector<32x9xf32>
    %c0_11 = arith.constant 0 : index
    %c0_12 = arith.constant 0 : index
    %13 = vector.load %arg6[%c0_11, %c0_12] : memref<9x256xf32, #tpu.memory_space<vmem>>, vector<9x256xf32>
    %cst_13 = arith.constant 0.000000e+00 : f32
    %14 = vector.broadcast %cst_13 : f32 to vector<32x256xf32>
    %15 = vector.extract_strided_slice %12 {offsets = [0, 0], sizes = [32, 1], strides = [1, 1]} : vector<32x9xf32> to vector<32x1xf32>
    %c17_i32 = arith.constant 17 : i32
    %16 = tpu.dynamic_rotate %11 by %c17_i32 dim 1 : vector<32x256xf32>, i32 -> vector<32x256xf32>
    %17 = vector.broadcast %15 : vector<32x1xf32> to vector<32x256xf32>
    %18 = arith.mulf %16, %17 : vector<32x256xf32>
    %19 = vector.extract_strided_slice %13 {offsets = [0, 0], sizes = [1, 256], strides = [1, 1]} : vector<9x256xf32> to vector<1x256xf32>
    %20 = vector.broadcast %19 : vector<1x256xf32> to vector<32x256xf32>
    %21 = arith.mulf %18, %20 : vector<32x256xf32>
    %22 = arith.addf %14, %21 : vector<32x256xf32>
    %23 = vector.extract_strided_slice %12 {offsets = [0, 1], sizes = [32, 1], strides = [1, 1]} : vector<32x9xf32> to vector<32x1xf32>
    %c16_i32 = arith.constant 16 : i32
    %24 = tpu.dynamic_rotate %11 by %c16_i32 dim 1 : vector<32x256xf32>, i32 -> vector<32x256xf32>
    %25 = vector.broadcast %23 : vector<32x1xf32> to vector<32x256xf32>
    %26 = arith.mulf %24, %25 : vector<32x256xf32>
    %27 = vector.extract_strided_slice %13 {offsets = [1, 0], sizes = [1, 256], strides = [1, 1]} : vector<9x256xf32> to vector<1x256xf32>
    %28 = vector.broadcast %27 : vector<1x256xf32> to vector<32x256xf32>
    %29 = arith.mulf %26, %28 : vector<32x256xf32>
    %30 = arith.addf %22, %29 : vector<32x256xf32>
    %31 = vector.extract_strided_slice %12 {offsets = [0, 2], sizes = [32, 1], strides = [1, 1]} : vector<32x9xf32> to vector<32x1xf32>
    %c15_i32 = arith.constant 15 : i32
    %32 = tpu.dynamic_rotate %11 by %c15_i32 dim 1 : vector<32x256xf32>, i32 -> vector<32x256xf32>
    %33 = vector.broadcast %31 : vector<32x1xf32> to vector<32x256xf32>
    %34 = arith.mulf %32, %33 : vector<32x256xf32>
    %35 = vector.extract_strided_slice %13 {offsets = [2, 0], sizes = [1, 256], strides = [1, 1]} : vector<9x256xf32> to vector<1x256xf32>
    %36 = vector.broadcast %35 : vector<1x256xf32> to vector<32x256xf32>
    %37 = arith.mulf %34, %36 : vector<32x256xf32>
    %38 = arith.addf %30, %37 : vector<32x256xf32>
    %39 = vector.extract_strided_slice %12 {offsets = [0, 3], sizes = [32, 1], strides = [1, 1]} : vector<32x9xf32> to vector<32x1xf32>
    %c1_i32 = arith.constant 1 : i32
    %40 = tpu.dynamic_rotate %11 by %c1_i32 dim 1 : vector<32x256xf32>, i32 -> vector<32x256xf32>
    %41 = vector.broadcast %39 : vector<32x1xf32> to vector<32x256xf32>
    %42 = arith.mulf %40, %41 : vector<32x256xf32>
    %43 = vector.extract_strided_slice %13 {offsets = [3, 0], sizes = [1, 256], strides = [1, 1]} : vector<9x256xf32> to vector<1x256xf32>
    %44 = vector.broadcast %43 : vector<1x256xf32> to vector<32x256xf32>
    %45 = arith.mulf %42, %44 : vector<32x256xf32>
    %46 = arith.addf %38, %45 : vector<32x256xf32>
    %47 = vector.extract_strided_slice %12 {offsets = [0, 4], sizes = [32, 1], strides = [1, 1]} : vector<32x9xf32> to vector<32x1xf32>
    %48 = vector.broadcast %47 : vector<32x1xf32> to vector<32x256xf32>
    %49 = arith.mulf %11, %48 : vector<32x256xf32>
    %50 = arith.addf %46, %49 : vector<32x256xf32>
    %51 = vector.extract_strided_slice %12 {offsets = [0, 5], sizes = [32, 1], strides = [1, 1]} : vector<32x9xf32> to vector<32x1xf32>
    %c255_i32 = arith.constant 255 : i32
    %52 = tpu.dynamic_rotate %11 by %c255_i32 dim 1 : vector<32x256xf32>, i32 -> vector<32x256xf32>
    %53 = vector.broadcast %51 : vector<32x1xf32> to vector<32x256xf32>
    %54 = arith.mulf %52, %53 : vector<32x256xf32>
    %55 = vector.extract_strided_slice %13 {offsets = [5, 0], sizes = [1, 256], strides = [1, 1]} : vector<9x256xf32> to vector<1x256xf32>
    %56 = vector.broadcast %55 : vector<1x256xf32> to vector<32x256xf32>
    %57 = arith.mulf %54, %56 : vector<32x256xf32>
    %58 = arith.addf %50, %57 : vector<32x256xf32>
    %59 = vector.extract_strided_slice %12 {offsets = [0, 6], sizes = [32, 1], strides = [1, 1]} : vector<32x9xf32> to vector<32x1xf32>
    %c241_i32 = arith.constant 241 : i32
    %60 = tpu.dynamic_rotate %11 by %c241_i32 dim 1 : vector<32x256xf32>, i32 -> vector<32x256xf32>
    %61 = vector.broadcast %59 : vector<32x1xf32> to vector<32x256xf32>
    %62 = arith.mulf %60, %61 : vector<32x256xf32>
    %63 = vector.extract_strided_slice %13 {offsets = [6, 0], sizes = [1, 256], strides = [1, 1]} : vector<9x256xf32> to vector<1x256xf32>
    %64 = vector.broadcast %63 : vector<1x256xf32> to vector<32x256xf32>
    %65 = arith.mulf %62, %64 : vector<32x256xf32>
    %66 = arith.addf %58, %65 : vector<32x256xf32>
    %67 = vector.extract_strided_slice %12 {offsets = [0, 7], sizes = [32, 1], strides = [1, 1]} : vector<32x9xf32> to vector<32x1xf32>
    %c240_i32 = arith.constant 240 : i32
    %68 = tpu.dynamic_rotate %11 by %c240_i32 dim 1 : vector<32x256xf32>, i32 -> vector<32x256xf32>
    %69 = vector.broadcast %67 : vector<32x1xf32> to vector<32x256xf32>
    %70 = arith.mulf %68, %69 : vector<32x256xf32>
    %71 = vector.extract_strided_slice %13 {offsets = [7, 0], sizes = [1, 256], strides = [1, 1]} : vector<9x256xf32> to vector<1x256xf32>
    %72 = vector.broadcast %71 : vector<1x256xf32> to vector<32x256xf32>
    %73 = arith.mulf %70, %72 : vector<32x256xf32>
    %74 = arith.addf %66, %73 : vector<32x256xf32>
    %75 = vector.extract_strided_slice %12 {offsets = [0, 8], sizes = [32, 1], strides = [1, 1]} : vector<32x9xf32> to vector<32x1xf32>
    %c239_i32 = arith.constant 239 : i32
    %76 = tpu.dynamic_rotate %11 by %c239_i32 dim 1 : vector<32x256xf32>, i32 -> vector<32x256xf32>
    %77 = vector.broadcast %75 : vector<32x1xf32> to vector<32x256xf32>
    %78 = arith.mulf %76, %77 : vector<32x256xf32>
    %79 = vector.extract_strided_slice %13 {offsets = [8, 0], sizes = [1, 256], strides = [1, 1]} : vector<9x256xf32> to vector<1x256xf32>
    %80 = vector.broadcast %79 : vector<1x256xf32> to vector<32x256xf32>
    %81 = arith.mulf %78, %80 : vector<32x256xf32>
    %82 = arith.addf %74, %81 : vector<32x256xf32>
    %c0_14 = arith.constant 0 : index
    %c0_15 = arith.constant 0 : index
    %83 = vector.load %arg7[%c0_14, %c0_15] : memref<32x1xf32, #tpu.memory_space<vmem>>, vector<32x1xf32>
    %84 = vector.broadcast %83 : vector<32x1xf32> to vector<32x256xf32>
    %85 = arith.mulf %82, %84 : vector<32x256xf32>
    %c0_16 = arith.constant 0 : index
    %c0_17 = arith.constant 0 : index
    %86 = vector.load %arg8[%c0_16, %c0_17] : memref<32x1xf32, #tpu.memory_space<vmem>>, vector<32x1xf32>
    %87 = vector.broadcast %86 : vector<32x1xf32> to vector<32x256xf32>
    %88 = arith.addf %85, %87 : vector<32x256xf32>
    %cst_18 = arith.constant 0.000000e+00 : f32
    %89 = vector.broadcast %cst_18 : f32 to vector<32x256xf32>
    %90 = arith.maximumf %88, %89 : vector<32x256xf32>
    %cst_19 = arith.constant dense<0.000000e+00> : vector<32xf32>
    %91 = vector.multi_reduction <add>, %90, %cst_19 [1] : vector<32x256xf32> to vector<32xf32>
    %92 = vector.shape_cast %91 : vector<32xf32> to vector<32x1xf32>
    %cst_20 = arith.constant 2.560000e+02 : f32
    %93 = vector.broadcast %cst_20 : f32 to vector<32x1xf32>
    %94 = arith.divf %92, %93 : vector<32x1xf32>
    %c0_21 = arith.constant 0 : index
    %c0_22 = arith.constant 0 : index
    %95 = vector.load %arg9[%c0_21, %c0_22] : memref<8x32xf32, #tpu.memory_space<vmem>>, vector<8x32xf32>
    %cst_23 = arith.constant dense<0.000000e+00> : vector<8x1xf32>
    %96 = tpu.matmul %95, %94, %cst_23 {dimension_numbers = #tpu.dot_dimension_numbers<[1], [0], [0], [1], [0, 0, 1, 1], [], []>} : vector<8x32xf32>, vector<32x1xf32>, vector<8x1xf32> -> vector<8x1xf32>
    %c0_24 = arith.constant 0 : index
    %c0_25 = arith.constant 0 : index
    %97 = vector.load %arg10[%c0_24, %c0_25] : memref<8x1xf32, #tpu.memory_space<vmem>>, vector<8x1xf32>
    %98 = arith.addf %96, %97 : vector<8x1xf32>
    %cst_26 = arith.constant 0.000000e+00 : f32
    %99 = vector.broadcast %cst_26 : f32 to vector<8x1xf32>
    %100 = arith.maximumf %98, %99 : vector<8x1xf32>
    %c0_27 = arith.constant 0 : index
    %c0_28 = arith.constant 0 : index
    %101 = vector.load %arg11[%c0_27, %c0_28] : memref<32x8xf32, #tpu.memory_space<vmem>>, vector<32x8xf32>
    %cst_29 = arith.constant dense<0.000000e+00> : vector<32x1xf32>
    %102 = tpu.matmul %101, %100, %cst_29 {dimension_numbers = #tpu.dot_dimension_numbers<[1], [0], [0], [1], [0, 0, 1, 1], [], []>} : vector<32x8xf32>, vector<8x1xf32>, vector<32x1xf32> -> vector<32x1xf32>
    %c0_30 = arith.constant 0 : index
    %c0_31 = arith.constant 0 : index
    %103 = vector.load %arg12[%c0_30, %c0_31] : memref<32x1xf32, #tpu.memory_space<vmem>>, vector<32x1xf32>
    %104 = arith.addf %102, %103 : vector<32x1xf32>
    %105 = arith.negf %104 : vector<32x1xf32>
    %106 = math.exp %105 : vector<32x1xf32>
    %cst_32 = arith.constant 1.000000e+00 : f32
    %107 = vector.broadcast %cst_32 : f32 to vector<32x1xf32>
    %108 = arith.addf %107, %106 : vector<32x1xf32>
    %109 = arith.divf %107, %108 : vector<32x1xf32>
    %110 = vector.broadcast %109 : vector<32x1xf32> to vector<32x256xf32>
    %111 = arith.mulf %90, %110 : vector<32x256xf32>
    %c0_33 = arith.constant 0 : index
    %c0_34 = arith.constant 0 : index
    %112 = vector.load %arg13[%c0_33, %c0_34] : memref<8x32xf32, #tpu.memory_space<vmem>>, vector<8x32xf32>
    %cst_35 = arith.constant dense<0.000000e+00> : vector<8x256xf32>
    %113 = tpu.matmul %112, %111, %cst_35 {dimension_numbers = #tpu.dot_dimension_numbers<[1], [0], [0], [1], [0, 0, 1, 1], [], []>} : vector<8x32xf32>, vector<32x256xf32>, vector<8x256xf32> -> vector<8x256xf32>
    %c0_36 = arith.constant 0 : index
    %c0_37 = arith.constant 0 : index
    %114 = vector.load %arg14[%c0_36, %c0_37] : memref<8x1xf32, #tpu.memory_space<vmem>>, vector<8x1xf32>
    %115 = vector.broadcast %114 : vector<8x1xf32> to vector<8x256xf32>
    %116 = arith.mulf %113, %115 : vector<8x256xf32>
    %c0_38 = arith.constant 0 : index
    %c0_39 = arith.constant 0 : index
    %117 = vector.load %arg15[%c0_38, %c0_39] : memref<8x1xf32, #tpu.memory_space<vmem>>, vector<8x1xf32>
    %118 = vector.broadcast %117 : vector<8x1xf32> to vector<8x256xf32>
    %119 = arith.addf %116, %118 : vector<8x256xf32>
    %120 = arith.addf %119, %1 : vector<8x256xf32>
    %c0_40 = arith.constant 0 : index
    %c0_41 = arith.constant 0 : index
    %c0_42 = arith.constant 0 : index
    %121 = vector.load %arg16[%c0_40, %c0_41, %c0_42] : memref<1x8x256xf32, #tpu.memory_space<vmem>>, vector<1x8x256xf32>
    %122 = vector.shape_cast %121 : vector<1x8x256xf32> to vector<8x256xf32>
    %123 = vector.shape_cast %120 : vector<8x256xf32> to vector<1x8x256xf32>
    tpu.vector_store %arg16[%c0_40, %c0_41, %c0_42], %123 {strides = array<i32>} : memref<1x8x256xf32, #tpu.memory_space<vmem>>, vector<1x8x256xf32>,
    return
  }
  func.func @transform_0(%arg0: i32) -> (i32, i32, i32) {
    %c0_i32 = arith.constant 0 : i32
    %c0_i32_0 = arith.constant 0 : i32
    %c0_i32_1 = arith.constant 0 : i32
    return %arg0, %c0_i32, %c0_i32_0 : i32, i32, i32
  }
  func.func @transform_1(%arg0: i32) -> (i32, i32) {
    %c0_i32 = arith.constant 0 : i32
    %c0_i32_0 = arith.constant 0 : i32
    %c0_i32_1 = arith.constant 0 : i32
    return %c0_i32, %c0_i32_0 : i32, i32
  }
  func.func @transform_2(%arg0: i32) -> (i32, i32) {
    %c0_i32 = arith.constant 0 : i32
    %c0_i32_0 = arith.constant 0 : i32
    %c0_i32_1 = arith.constant 0 : i32
    return %c0_i32, %c0_i32_0 : i32, i32
  }
  func.func @transform_3(%arg0: i32) -> (i32, i32) {
    %c0_i32 = arith.constant 0 : i32
    %c0_i32_0 = arith.constant 0 : i32
    %c0_i32_1 = arith.constant 0 : i32
    return %c0_i32, %c0_i32_0 : i32, i32
  }
  func.func @transform_4(%arg0: i32) -> (i32, i32) {
    %c0_i32 = arith.constant 0 : i32
    %c0_i32_0 = arith.constant 0 : i32
    %c0_i32_1 = arith.constant 0 : i32
    return %c0_i32, %c0_i32_0 : i32, i32
  }
  func.func @transform_5(%arg0: i32) -> (i32, i32) {
    %c0_i32 = arith.constant 0 : i32
    %c0_i32_0 = arith.constant 0 : i32
    %c0_i32_1 = arith.constant 0 : i32
    return %c0_i32, %c0_i32_0 : i32, i32
  }
  func.func @transform_6(%arg0: i32) -> (i32, i32) {
    %c0_i32 = arith.constant 0 : i32
    %c0_i32_0 = arith.constant 0 : i32
    %c0_i32_1 = arith.constant 0 : i32
    return %c0_i32, %c0_i32_0 : i32, i32
  }
  func.func @transform_7(%arg0: i32) -> (i32, i32) {
    %c0_i32 = arith.constant 0 : i32
    %c0_i32_0 = arith.constant 0 : i32
    %c0_i32_1 = arith.constant 0 : i32
    return %c0_i32, %c0_i32_0 : i32, i32
  }
  func.func @transform_8(%arg0: i32) -> (i32, i32) {
    %c0_i32 = arith.constant 0 : i32
    %c0_i32_0 = arith.constant 0 : i32
    %c0_i32_1 = arith.constant 0 : i32
    return %c0_i32, %c0_i32_0 : i32, i32
  }
  func.func @transform_9(%arg0: i32) -> (i32, i32) {
    %c0_i32 = arith.constant 0 : i32
    %c0_i32_0 = arith.constant 0 : i32
    %c0_i32_1 = arith.constant 0 : i32
    return %c0_i32, %c0_i32_0 : i32, i32
  }
  func.func @transform_10(%arg0: i32) -> (i32, i32) {
    %c0_i32 = arith.constant 0 : i32
    %c0_i32_0 = arith.constant 0 : i32
    %c0_i32_1 = arith.constant 0 : i32
    return %c0_i32, %c0_i32_0 : i32, i32
  }
  func.func @transform_11(%arg0: i32) -> (i32, i32) {
    %c0_i32 = arith.constant 0 : i32
    %c0_i32_0 = arith.constant 0 : i32
    %c0_i32_1 = arith.constant 0 : i32
    return %c0_i32, %c0_i32_0 : i32, i32
  }
  func.func @transform_12(%arg0: i32) -> (i32, i32) {
    %c0_i32 = arith.constant 0 : i32
    %c0_i32_0 = arith.constant 0 : i32
    %c0_i32_1 = arith.constant 0 : i32
    return %c0_i32, %c0_i32_0 : i32, i32
  }
  func.func @transform_13(%arg0: i32) -> (i32, i32) {
    %c0_i32 = arith.constant 0 : i32
    %c0_i32_0 = arith.constant 0 : i32
    %c0_i32_1 = arith.constant 0 : i32
    return %c0_i32, %c0_i32_0 : i32, i32
  }
  func.func @transform_14(%arg0: i32) -> (i32, i32) {
    %c0_i32 = arith.constant 0 : i32
    %c0_i32_0 = arith.constant 0 : i32
    %c0_i32_1 = arith.constant 0 : i32
    return %c0_i32, %c0_i32_0 : i32, i32
  }
  func.func @transform_15(%arg0: i32) -> (i32, i32, i32) {
    %c0_i32 = arith.constant 0 : i32
    %c0_i32_0 = arith.constant 0 : i32
    %c0_i32_1 = arith.constant 0 : i32
    return %arg0, %c0_i32, %c0_i32_0 : i32, i32, i32
  }
}

</mosaic_0001>

<bundles_post_ra>
// kernel: tpu_custom_call.1
= control target key start
LH: loop header
LB: loop body
LE: loop exit
PB: predicated region body
PF: predicated region fallthrough
CT: control target
= control target key end

     0   :  { %20 = vsyncpa [#allocation3], 0  ;;  %s3184_s0 = inlined_call_operand.vmem [shape: f32[2,8,256], index: 0, kind: input, shape index: {}]   ;;  %s3185_s1 = inlined_call_operand.vmem [shape: f32[32,8], index: 1, kind: input, shape index: {}]   ;;  %s3186_s2 = inlined_call_operand.vmem [shape: f32[32,1], index: 2, kind: input, shape index: {}]   ;;  %s3187_s3 = inlined_call_operand.vmem [shape: f32[32,1], index: 3, kind: input, shape index: {}]   ;;  %s3188_s4 = inlined_call_operand.vmem [shape: f32[32,9], index: 4, kind: input, shape index: {}]   ;;  %s3189_s5 = inlined_call_operand.vmem [shape: f32[9,256], index: 5, kind: input, shape index: {}]   ;;  %s3190_s6 = inlined_call_operand.vmem [shape: f32[32,1], index: 6, kind: input, shape index: {}]   ;;  %s3191_s7 = inlined_call_operand.vmem [shape: f32[32,1], index: 7, kind: input, shape index: {}]   ;;  %s3192_s8 = inlined_call_operand.vmem [shape: f32[8,32], index: 8, kind: input, shape index: {}]   ;;  %s3193_s9 = inlined_call_operand.vmem [shape: f32[8,1], index: 9, kind: input, shape index: {}]   ;;  %s3194_s10 = inlined_call_operand.vmem [shape: f32[32,8], index: 10, kind: input, shape index: {}]   ;;  %s3195_s11 = inlined_call_operand.vmem [shape: f32[32,1], index: 11, kind: input, shape index: {}]   ;;  %s3196_s12 = inlined_call_operand.vmem [shape: f32[8,32], index: 12, kind: input, shape index: {}]   ;;  %s3197_s13 = inlined_call_operand.vmem [shape: f32[8,1], index: 13, kind: input, shape index: {}]   ;;  %s3198_s14 = inlined_call_operand.vmem [shape: f32[8,1], index: 14, kind: input, shape index: {}]   ;;  %s3199_s15 = inlined_call_operand.hbm [shape: f32[2,8,256], index: 15, kind: output, shape index: {}]  }
   0x1   :  { %22 = vsyncpa [#allocation3 + $0x1], 0  ;;  %s2138_s18 = smov 0   ;;  %s2140_s19 = smov 0  }
   0x2   :  { %s2142_s20 = smov 0   ;;  %s2144_s21 = smov 0  }
   0x3 LB: > { %3233 = sst [smem:[#allocation5_spill]] %s2023_s18  ;;  %s2159_s22 = sadd.s32 4294967295, %s2035_s21   ;;  %s2035_s21 = sphi %s2144_s21, %s3293_s21   ;;  %s2031_s20 = sphi %s2142_s20, %s3298_s20   ;;  %s2027_s19 = sphi %s2140_s19, %s3297_s19   ;;  %s2023_s18 = sphi %s2138_s18, %s3296_s18  }
   0x4   : > { %3234 = sst [smem:[#allocation6_spill]] %s2031_s20  ;;  %s1795_s23 = sadd.s32 4294967294, %s2035_s21  }
   0x5   : > { %s2163_s24 = sadd.s32 1, %s2035_s21   ;;  %s355_s25 = sadd.s32 1, %s2031_s20 }
   0x6   : > { %3235 = sst [smem:[#allocation7_spill]] %s2163_s24  ;;  %s352_s26 = ssub.s32 %s2035_s21, %s2163_s24 }
   0x7   : > { %p365_p0 = scmp.ne.s32.totalorder %s2031_s20, %s2027_s19  ;;  %p353_p1 = scmp.eq.s32.totalorder %s352_s26, 0 }
   0x8   : > { %p366_p2 = scmp.eq.s32.totalorder %s2159_s22, 1  ;;  %p371_p3 = scmp.ne.s32.totalorder %s2027_s19, %s2023_s18 }
   0x9   : > { %p372_p4 = scmp.eq.s32.totalorder %s1795_s23, 1  ;;  %p1798_p7 = scmp.ge.s32.totalorder %s2035_s21, 1 }
   0xa   : > { %s2174_s27 = scalar_select %p353_p1, %s2031_s20, %s355_s25  }
   0xb   : > { %p2176_p5 = por %p366_p2, %p365_p0  ;;  %p2180_p6 = por %p372_p4, %p371_p3 }
   0xc   : > { %3236 = sst [smem:[#allocation8_spill]] %s2174_s27  ;;  %p440_p8 = scmp.lt.s32.totalorder %s2035_s21, 3 }
   0xd   : > { %s3238_s29 = scalar_select %p2180_p6, 1, 0 }
   0xe   : > { %p441_p9 = pnand %p1798_p7, %p440_p8 }
   0xf   : > { %3239 = sst [smem:[#allocation9_spill]] %s3238_s29 }
  0x10   : > { %444 = sbr.rel (%p441_p9) target bundleno = 1513 (0x5e9), region = 80 }
  0x17   : > { %p488_p10 = scmp.lt.s32.totalorder %s2159_s22, 1  ;;  %v2190_v0 = vld [vmem:[%s3188_s4] sm:$0xff]  ;;  %v2037_v1 = vmov 1   ;;  %v3205_v2 = vmov 0.0   ;;  %v2039_v3 = vmov 0   ;;  %v2200_v4 = vld [vmem:[%s3188_s4 + $0x10] sm:$0xff] }
  0x18   : > { %1928 = vset.pattern.permute.xlu0 %v2037_v1  ;;  %576 = vmatprep.mubr.f32.mxu0 %v3205_v2  ;;  %v633_v5 = vld [vmem:[%s3187_s3] sm:$0xff]  ;;  %v634_v6 = vld [vmem:[%s3187_s3 + $0x8] sm:$0xff]  ;;  %vm499_vm0 = vcmask 64512   ;;  %v604_v11 = vld [vmem:[%s3186_s2 + $0x18] sm:$0xff]  ;;  %v2040_v13 = vmov 2   ;;  %v2041_v17 = vmov 3  }
  0x19   : > { %s489_s17 = scalar_select %p488_p10, %s2159_s22, 1  ;;  %786 = vperm.xlu0 %1928, %v2190_v0   ;;  %1927 = vset.pattern.permute.xlu1 %v2039_v3  ;;  %v495_v9 = vld [vmem:[%s3185_s1] sm:$0xff]  ;;  %v2222_v10 = vld [vmem:[%s3188_s4 + $0x8] sm:$0xff]  ;;  %v636_v14 = vld [vmem:[%s3187_s3 + $0x18] sm:$0xff]  ;;  %v2042_v19 = vmov 4   ;;  %v2043_v20 = vmov 5  }
  0x1a   : > { %639 = vperm.xlu1 %1927, %v633_v5   ;;  %v496_v12 = vld [vmem:[%s3185_s1 + $0x8] sm:$0xff]  ;;  %v497_v15 = vld [vmem:[%s3185_s1 + $0x10] sm:$0xff]  ;;  %v498_v16 = vld [vmem:[%s3185_s1 + $0x18] sm:$0xff]  ;;  %v2044_v21 = vmov 6   ;;  %v2045_v22 = vmov 7   ;;  %v2046_v23 = vmov 8  }
  0x1b   : > { %s1823_s16 = sshll.u32 %s489_s17, 4  ;;  %v2253_v18 = vld [vmem:[%s3188_s4 + $0x18] sm:$0xff]  ;;  %v601_v24 = vld [vmem:[%s3186_s2] sm:$0xff]  ;;  %v602_v25 = vld [vmem:[%s3186_s2 + $0x8] sm:$0xff]  ;;  %s2047_s23 = smov 16   ;;  %vm2056_vm9 = vmmov 0  }
  0x1c   : > { %s2208_s24 = scalar_lea.vmem %s3184_s0, %s1823_s16  ;;  %v603_v26 = vld [vmem:[%s3186_s2 + $0x10] sm:$0xff]  ;;  %v1303_v28 = vld [vmem:[%s3190_s6] sm:$0xff]  ;;  %v1304_v29 = vld [vmem:[%s3190_s6 + $0x8] sm:$0xff]  ;;  %s2048_s25 = smov 17   ;;  %vm1394_vm10 = vcmask 261120  }
  0x1d   : > { %v494_v7 = vld [vmem:[%s2208_s24 + $0x8] sm:$0xff]  ;;  %v493_v8 = vld [vmem:[%s2208_s24] sm:$0xff]  ;;  %794 = vperm.xlu0 %1928, %v2200_v4   ;;  %v635_v27 = vld [vmem:[%s3187_s3 + $0x10] sm:$0xff]  ;;  %s2049_s20 = smov 127   ;;  %s2050_s27 = smov 15  }
  0x1e   : > { %512 = vmatprep.subr.mxu0 %v494_v7  ;;  %644 = vperm.xlu1 %1927, %v634_v6   ;;  %v1335_v30 = vld [vmem:[%s3191_s7] sm:$0xff]  ;;  %s2051_s18 = smov 111   ;;  %s2052_s29 = smov 1  }
  0x1f   : > { %513 = vmatpush1.msra.mxu0 %v493_v8  ;;  %s2053_s17 = smov 113   ;;  %s2054_s26 = smov 112  }
  0x20   : > { %1802 = vmatmul.mubr.msk.f32.vlgmr.msra.gmra.mrb[0].mxu0 %vm499_vm0, %v495_v9  ;;  %s1824_s30 = sshll.u32 %s2159_s22, 8 }
  0x21   : > { %582 = vmatprep.mubr.f32.mxu0 %v3205_v2  ;;  %1932 = vset.pattern.permute.xlu0 %v2040_v13 }
  0x22   : > { %863 = vperm.xlu0 %1932, %v2222_v10   ;;  %622 = vperm.xlu1 %1927, %v604_v11  }
  0x24   : > { %1803 = vmatmul.mubr.msk.f32.gmra.mrb[2].mxu0 %vm499_vm0, %v496_v12 }
  0x25   : > { %588 = vmatprep.mubr.f32.mxu0 %v3205_v2 }
  0x26   : > { %867 = vperm.xlu0 %1932, %v2200_v4   ;;  %654 = vperm.xlu1 %1927, %v636_v14  }
  0x28   : > { %1804 = vmatmul.mubr.msk.f32.gmra.mrb[4].mxu0 %vm499_vm0, %v497_v15 }
  0x29   : > { %594 = vmatprep.mubr.f32.mxu0 %v3205_v2 }
  0x2a   : > { %1935 = vset.pattern.permute.xlu0 %v2041_v17  ;;  %715 = vperm.xlu1 %1927, %v2222_v10  }
  0x2b   : > { %936 = vperm.xlu0 %1935, %v2222_v10  }
  0x2c   : > { %1805 = vmatmul.mubr.msk.f32.gmra.mrb[6].mxu0 %vm499_vm0, %v498_v16 }
  0x2d   : > { %1694 = vmatprep.mubr.f32.mxu0 %v3205_v2 }
  0x2e   : > { %1929 = vset.pattern.permute.xlu1 %v2037_v1 }
  0x2f   : > { %944 = vperm.xlu0 %1935, %v2253_v18   ;;  %790 = vperm.xlu1 %1929, %v2222_v10  }
  0x33   : > { %1941 = vset.pattern.permute.xlu0 %v2042_v19  ;;  %1930 = vset.pattern.permute.xlu1 %v2040_v13 }
  0x34   : > { %988 = vperm.xlu0 %1941, %v2200_v4   ;;  %859 = vperm.xlu1 %1930, %v2190_v0  }
  0x38   : > { %1942 = vset.pattern.permute.xlu0 %v2043_v20  ;;  %1931 = vset.pattern.permute.xlu1 %v2039_v3 }
  0x39   : > { %1037 = vperm.xlu0 %1942, %v2190_v0   ;;  %720 = vperm.xlu1 %1931, %v2200_v4  }
  0x3d   : > { %1049 = vperm.xlu0 %1942, %v2253_v18   ;;  %725 = vperm.xlu1 %1931, %v2253_v18  }
  0x41   : > { %1945 = vset.pattern.permute.xlu0 %v2044_v21  ;;  %1933 = vset.pattern.permute.xlu1 %v2037_v1 }
  0x42   : > { %1114 = vperm.xlu0 %1945, %v2222_v10   ;;  %798 = vperm.xlu1 %1933, %v2253_v18  }
  0x46   : > { %1118 = vperm.xlu0 %1945, %v2200_v4   ;;  %1934 = vset.pattern.permute.xlu1 %v2041_v17 }
  0x47   : > { %932 = vperm.xlu1 %1934, %v2190_v0  }
  0x4a   : > { %1949 = vset.pattern.permute.xlu0 %v2045_v22 }
  0x4b   : > { %1191 = vperm.xlu0 %1949, %v2200_v4   ;;  %1936 = vset.pattern.permute.xlu1 %v2040_v13 }
  0x4c   : > { %871 = vperm.xlu1 %1936, %v2253_v18  }
  0x4f   : > { %1950 = vset.pattern.permute.xlu0 %v2046_v23 }
  0x50   : > { %1260 = vperm.xlu0 %1950, %v2222_v10   ;;  %1937 = vset.pattern.permute.xlu1 %v2041_v17 }
  0x51   : > { %940 = vperm.xlu1 %1937, %v2200_v4  }
  0x54   : > { %1268 = vperm.xlu0 %1950, %v2253_v18  }
  0x55   : > { %1938 = vset.pattern.permute.xlu1 %v2042_v19 }
  0x56   : > { %980 = vperm.xlu1 %1938, %v2190_v0  }
  0x58   : > { %1953 = vset.pattern.permute.xlu0 %v2039_v3 }
  0x59   : > { %607 = vperm.xlu0 %1953, %v601_v24  }
  0x5a   : > { %984 = vperm.xlu1 %1938, %v2222_v10  }
  0x5d   : > { %612 = vperm.xlu0 %1953, %v602_v25  }
  0x5e   : > { %1939 = vset.pattern.permute.xlu1 %v2043_v20 }
  0x5f   : > { %1041 = vperm.xlu1 %1939, %v2222_v10  }
  0x61   : > { %617 = vperm.xlu0 %1953, %v603_v26  }
  0x63   : > { %1940 = vset.pattern.permute.xlu1 %v2044_v21 }
  0x64   : > { %1110 = vperm.xlu1 %1940, %v2190_v0  }
  0x65   : > { %649 = vperm.xlu0 %1953, %v635_v27  }
  0x68   : > { %1943 = vset.pattern.permute.xlu1 %v2042_v19 }
  0x69   : > { %710 = vperm.xlu0 %1953, %v2190_v0   ;;  %992 = vperm.xlu1 %1943, %v2253_v18  }
  0x6d   : > { %1309 = vperm.xlu0 %1953, %v1303_v28   ;;  %1944 = vset.pattern.permute.xlu1 %v2043_v20 }
  0x6e   : > { %1045 = vperm.xlu1 %1944, %v2200_v4  }
  0x72   : > { %1946 = vset.pattern.permute.xlu1 %v2045_v22 }
  0x73   : > { %1183 = vperm.xlu1 %1946, %v2190_v0  }
  0x77   : > { %1187 = vperm.xlu1 %1946, %v2222_v10  }
  0x7b   : > { %1947 = vset.pattern.permute.xlu1 %v2044_v21 }
  0x7c   : > { %1122 = vperm.xlu1 %1947, %v2253_v18  }
  0x80   : > { %1948 = vset.pattern.permute.xlu1 %v2046_v23 }
  0x81   : > { %1256 = vperm.xlu1 %1948, %v2190_v0  }
  0x85   : > { %1951 = vset.pattern.permute.xlu1 %v2045_v22 }
  0x86   : > { %1195 = vperm.xlu1 %1951, %v2253_v18  }
  0x8a   : > { %1952 = vset.pattern.permute.xlu1 %v2046_v23 }
  0x8b   : > { %1264 = vperm.xlu1 %1952, %v2200_v4  }
  0x8f   : > { %1954 = vset.pattern.permute.xlu1 %v2039_v3 }
  0x90   : > { %1314 = vperm.xlu1 %1954, %v1304_v29  }
  0x94   : > { %1341 = vperm.xlu1 %1954, %v1335_v30  }
  0x98   : > { %v2312_v31 = vpop.permute.xlu0 %786 }
  0x99   : > { %v640_v39 = vpop.permute.xlu1 %639 }
  0x9c   : > { %v2314_v32 = vpop.permute.xlu0 %794 }
  0x9d   : > { %v2330_v41 = vpop.permute.xlu1 %644 }
  0xa1   : > { %v2316_v33 = vpop.permute.xlu0 %863  ;;  %v2334_v43 = vpop.permute.xlu1 %622 }
  0xa5   : > { %v2318_v34 = vpop.permute.xlu0 %867  ;;  %v2338_v45 = vpop.permute.xlu1 %654 }
  0xa9   : > { %v2342_v47 = vpop.permute.xlu1 %715 }
  0xaa   : > { %v2320_v35 = vpop.permute.xlu0 %936 }
  0xae   : > { %v2322_v36 = vpop.permute.xlu0 %944  ;;  %v2346_v49 = vpop.permute.xlu1 %790 }
  0xaf   : > { %3240 = vst [vmem:[#allocation10_spill] sm:$0xff] %v2322_v36 }
  0xb3   : > { %v2324_v37 = vpop.permute.xlu0 %988  ;;  %v2350_v51 = vpop.permute.xlu1 %859 }
  0xb4   : > { %3241 = vst [vmem:[#allocation11_spill] sm:$0xff] %v2324_v37 }
  0xb8   : > { %v2326_v38 = vpop.permute.xlu0 %1037  ;;  %v2352_v56 = vpop.permute.xlu1 %720 }
  0xbc   : > { %v2328_v40 = vpop.permute.xlu0 %1049  ;;  %v2360_v62 = vpop.permute.xlu1 %725 }
  0xbd   : > { %3242 = vst [vmem:[#allocation12_spill] sm:$0xff] %v2328_v40  ;;  %3246 = vst [vmem:[#allocation16_spill] sm:$0xff] %v2360_v62 }
  0xc1   : > { %v2332_v42 = vpop.permute.xlu0 %1114  ;;  %v2368_v5 = vpop.permute.xlu1 %798 }
  0xc2   : > { %3247 = vst [vmem:[#allocation17_spill] sm:$0xff] %v2368_v5 }
  0xc5   : > { %v2336_v44 = vpop.permute.xlu0 %1118 }
  0xc6   : > { %3243 = vst [vmem:[#allocation13_spill] sm:$0xff] %v2336_v44  ;;  %v2380_v7 = vpop.permute.xlu1 %932 }
  0xca   : > { %v2340_v46 = vpop.permute.xlu0 %1191 }
  0xcb   : > { %3244 = vst [vmem:[#allocation14_spill] sm:$0xff] %v2340_v46  ;;  %v2386_v8 = vpop.permute.xlu1 %871 }
  0xcc   : > { %3248 = vst [vmem:[#allocation18_spill] sm:$0xff] %v2386_v8 }
  0xcf   : > { %v2344_v48 = vpop.permute.xlu0 %1260 }
  0xd0   : > { %v2396_v11 = vpop.permute.xlu1 %940 }
  0xd3   : > { %v2348_v50 = vpop.permute.xlu0 %1268 }
  0xd4   : > { %3245 = vst [vmem:[#allocation15_spill] sm:$0xff] %v2348_v50 }
  0xd5   : > { %v2405_v14 = vpop.permute.xlu1 %980 }
  0xd8   : > { %v608_v52 = vpop.permute.xlu0 %607 }
  0xd9   : > { %v2416_v17 = vpop.permute.xlu1 %984 }
  0xdc   : > { %v613_v9 = vpop.permute.xlu0 %612 }
  0xde   : > { %v2424_v20 = vpop.permute.xlu1 %1041 }
  0xe0   : > { %v618_v19 = vpop.permute.xlu0 %617 }
  0xe3   : > { %v2434_v25 = vpop.permute.xlu1 %1110 }
  0xe4   : > { %v650_v22 = vpop.permute.xlu0 %649 }
  0xe8   : > { %v2442_v28 = vpop.permute.xlu1 %992 }
  0xe9   : > { %3250 = vst [vmem:[#allocation20_spill] sm:$0xff] %v2442_v28 }
  0xed   : > { %v2454_v30 = vpop.permute.xlu1 %1045 }
  0xee   : > { %3252 = vst [vmem:[#allocation22_spill] sm:$0xff] %v2454_v30 }
  0xf3   : > { %v578_v53 = vpop.f32.mrb[0].mxu0 }
  0xf4   : > { %v625_v54 = vmul.f32 %v608_v52, %v578_v53  ;;  %v580_v55 = vpop.f32.mrb[1].mxu0 }
  0xf5   : > { %v626_v63 = vmul.f32 %v608_v52, %v580_v55  ;;  %v2462_v52 = vpop.permute.xlu1 %1183 }
  0xf6   : > { %v657_v57 = vadd.f32 %v640_v39, %v625_v54 }
  0xf7   : > { %v584_v58 = vpop.f32.mrb[2].mxu0  ;;  %v658_v3 = vadd.f32 %v640_v39, %v626_v63  ;;  %v1336_v63 = vld [vmem:[%s3191_s7 + $0x8] sm:$0xff] }
  0xf8   : > { %v2354_v59 = vmax.f32 %v657_v57, 0.0  ;;  %v586_v60 = vpop.f32.mrb[3].mxu0  ;;  %v627_v10 = vmul.f32 %v613_v9, %v584_v58 }
  0xf9   : > { %v2374_v6 = vmax.f32 %v658_v3, 0.0  ;;  %v628_v15 = vmul.f32 %v613_v9, %v586_v60  ;;  %v2474_v54 = vpop.permute.xlu1 %1187  ;;  %v1306_v9 = vld [vmem:[%s3190_s6 + $0x18] sm:$0xff] }
  0xfa   : > { %760 = vrot.lane.b32.xlu0 %v2354_v59, %s2047_s23  ;;  %681 = vrot.lane.b32.xlu1 %v2354_v59, %s2048_s25  ;;  %v659_v12 = vadd.f32 %v2330_v41, %v627_v10 }
  0xfb   : > { %v590_v61 = vpop.f32.mrb[4].mxu0  ;;  %v660_v16 = vadd.f32 %v2330_v41, %v628_v15  ;;  %v697_v15 = vlaneseq }
  0xfc   : > { %v592_v0 = vpop.f32.mrb[5].mxu0  ;;  %v2403_v13 = vmax.f32 %v659_v12, 0.0  ;;  %v629_v21 = vmul.f32 %v618_v19, %v590_v61 }
  0xfd   : > { %v2422_v18 = vmax.f32 %v660_v16, 0.0  ;;  %v630_v24 = vmul.f32 %v618_v19, %v592_v0  ;;  %v2482_v57 = vpop.permute.xlu1 %1122  ;;  %v1338_v16 = vld [vmem:[%s3191_s7 + $0x18] sm:$0xff] }
  0xfe   : > { %1011 = vrot.lane.b32.xlu0 %v2354_v59, %s2049_s20  ;;  %833 = vrot.lane.b32.xlu1 %v2354_v59, %s2050_s27  ;;  %v661_v23 = vadd.f32 %v650_v22, %v629_v21  ;;  %3254 = vst [vmem:[#allocation24_spill] sm:$0xff] %v2482_v57 }
  0xff   : > { %v596_v1 = vpop.f32.mrb[6].mxu0  ;;  %v662_v27 = vadd.f32 %v650_v22, %v630_v24  ;;  %v2548_v22 = vshrl.u32 %v697_v15, 7 }
 0x100   : > { %v2366_v4 = vpop.f32.mrb[7].mxu0  ;;  %v2440_v26 = vmax.f32 %v661_v23, 0.0  ;;  %v631_v39 = vmul.f32 %v2334_v43, %v596_v1  ;;  %v711_v1 = vpop.permute.xlu0 %710 }
 0x101   : > { %v2448_v29 = vmax.f32 %v662_v27, 0.0  ;;  %v632_v55 = vmul.f32 %v2334_v43, %v2366_v4  ;;  %v2493_v60 = vpop.permute.xlu1 %1256  ;;  %v2554_v27 = vand.u32 127, %v697_v15  ;;  %v2575_v15 = vmul.f32 %v2405_v14, %v2354_v59 }
 0x102   : > { %1230 = vrot.lane.b32.xlu0 %v2354_v59, %s2051_s18  ;;  %906 = vrot.lane.b32.xlu1 %v2354_v59, %s2052_s29  ;;  %3249 = vst [vmem:[#allocation19_spill] sm:$0xff] %v2440_v26  ;;  %v663_v41 = vadd.f32 %v2338_v45, %v631_v39  ;;  %v738_v39 = vsub.s32 0, %v2548_v22  ;;  %v884_v2 = vsub.s32 2, %v2548_v22  ;;  %v1062_v50 = vsub.s32 5, %v2548_v22 }
 0x103   : > { %3251 = vst [vmem:[#allocation21_spill] sm:$0xff] %v2448_v29  ;;  %v664_v58 = vadd.f32 %v2338_v45, %v632_v55  ;;  %v811_v55 = vsub.s32 1, %v2548_v22  ;;  %vm699_vm1 = vcmp.lt.s32.totalorder %v2554_v27, 17  ;;  %vm776_vm2 = vcmp.lt.s32.totalorder %v2554_v27, 16 }
 0x104   : > { %v2468_v53 = vmax.f32 %v663_v41, 0.0  ;;  %v2530_v4 = vpop.permute.xlu0 %1309  ;;  %v2562_v41 = vld [vmem:[%s3189_s5] sm:$0xff]  ;;  %vm849_vm3 = vcmp.lt.s32.totalorder %v2554_v27, 15  ;;  %vm1027_vm4 = vcmp.lt.s32.totalorder %v2554_v27, 127  ;;  %vm922_vm5 = vcmp.lt.s32.totalorder %v2554_v27, 1 }
 0x105   : > { %v2495_v61 = vmax.f32 %v664_v58, 0.0  ;;  %v2501_v43 = vpop.permute.xlu1 %1195  ;;  %vm1100_vm6 = vcmp.lt.s32.totalorder %v2554_v27, 113  ;;  %vm1173_vm7 = vcmp.lt.s32.totalorder %v2554_v27, 112  ;;  %vm1246_vm8 = vcmp.lt.s32.totalorder %v2554_v27, 111 }
 0x106   : > { %1084 = vrot.lane.b32.xlu1 %v2354_v59, %s2053_s17  ;;  %689 = vrot.lane.b32.xlu0 %v2374_v6, %s2048_s25  ;;  %3253 = vst [vmem:[#allocation23_spill] sm:$0xff] %v2468_v53  ;;  %3256 = vst [vmem:[#allocation26_spill] sm:$0xff] %v2501_v43 }
 0x107   : > { %3255 = vst [vmem:[#allocation25_spill] sm:$0xff] %v2495_v61 }
 0x10a   : > { %1157 = vrot.lane.b32.xlu1 %v2354_v59, %s2054_s26  ;;  %768 = vrot.lane.b32.xlu0 %v2374_v6, %s2047_s23  ;;  %v2511_v45 = vpop.permute.xlu1 %1264  ;;  %v2592_v59 = vrot.slane %v2562_v41, %v811_v55 }
 0x10b   : > { %3257 = vst [vmem:[#allocation27_spill] sm:$0xff] %v2511_v45  ;;  %v2586_v45 = vmul.f32 %v2405_v14, %v2374_v6  ;;  %v957_v14 = vsub.s32 3, %v2548_v22 }
 0x10e   : > { %841 = vrot.lane.b32.xlu1 %v2374_v6, %s2050_s27  ;;  %1019 = vrot.lane.b32.xlu0 %v2374_v6, %s2049_s20 }
 0x10f   : > { %v2520_v0 = vpop.permute.xlu1 %1314 }
 0x110   : > { %3258 = vst [vmem:[#allocation28_spill] sm:$0xff] %v2520_v0 }
 0x112   : > { %914 = vrot.lane.b32.xlu1 %v2374_v6, %s2052_s29  ;;  %1092 = vrot.lane.b32.xlu0 %v2374_v6, %s2053_s17 }
 0x113   : > { %v2528_v3 = vpop.permute.xlu1 %1341 }
 0x116   : > { %1165 = vrot.lane.b32.xlu1 %v2374_v6, %s2054_s26  ;;  %1238 = vrot.lane.b32.xlu0 %v2374_v6, %s2051_s18 }
 0x11a   : > { %835 = vrot.lane.b32.xlu0 %v2403_v13, %s2050_s27  ;;  %683 = vrot.lane.b32.xlu1 %v2403_v13, %s2048_s25 }
 0x11e   : > { %908 = vrot.lane.b32.xlu0 %v2403_v13, %s2052_s29  ;;  %762 = vrot.lane.b32.xlu1 %v2403_v13, %s2047_s23 }
 0x122   : > { %1159 = vrot.lane.b32.xlu0 %v2403_v13, %s2054_s26  ;;  %1013 = vrot.lane.b32.xlu1 %v2403_v13, %s2049_s20 }
 0x126   : > { %1086 = vrot.lane.b32.xlu1 %v2403_v13, %s2053_s17  ;;  %843 = vrot.lane.b32.xlu0 %v2422_v18, %s2050_s27 }
 0x12a   : > { %1232 = vrot.lane.b32.xlu1 %v2403_v13, %s2051_s18  ;;  %916 = vrot.lane.b32.xlu0 %v2422_v18, %s2052_s29 }
 0x12e   : > { %1167 = vrot.lane.b32.xlu0 %v2422_v18, %s2054_s26  ;;  %691 = vrot.lane.b32.xlu1 %v2422_v18, %s2048_s25 }
 0x132   : > { %770 = vrot.lane.b32.xlu1 %v2422_v18, %s2047_s23  ;;  %910 = vrot.lane.b32.xlu0 %v2440_v26, %s2052_s29 }
 0x136   : > { %1021 = vrot.lane.b32.xlu1 %v2422_v18, %s2049_s20  ;;  %845 = vrot.lane.b32.xlu0 %v2448_v29, %s2050_s27 }
 0x13a   : > { %1094 = vrot.lane.b32.xlu1 %v2422_v18, %s2053_s17  ;;  %918 = vrot.lane.b32.xlu0 %v2448_v29, %s2052_s29 }
 0x13e   : > { %1240 = vrot.lane.b32.xlu1 %v2422_v18, %s2051_s18  ;;  %1096 = vrot.lane.b32.xlu0 %v2448_v29, %s2053_s17 }
 0x142   : > { %685 = vrot.lane.b32.xlu1 %v2440_v26, %s2048_s25  ;;  %687 = vrot.lane.b32.xlu0 %v2468_v53, %s2048_s25 }
 0x146   : > { %764 = vrot.lane.b32.xlu1 %v2440_v26, %s2047_s23  ;;  %766 = vrot.lane.b32.xlu0 %v2468_v53, %s2047_s23 }
 0x14a   : > { %837 = vrot.lane.b32.xlu1 %v2440_v26, %s2050_s27  ;;  %1017 = vrot.lane.b32.xlu0 %v2468_v53, %s2049_s20 }
 0x14e   : > { %1015 = vrot.lane.b32.xlu1 %v2440_v26, %s2049_s20  ;;  %1163 = vrot.lane.b32.xlu0 %v2468_v53, %s2054_s26 }
 0x152   : > { %1088 = vrot.lane.b32.xlu1 %v2440_v26, %s2053_s17  ;;  %695 = vrot.lane.b32.xlu0 %v2495_v61, %s2048_s25 }
 0x156   : > { %1161 = vrot.lane.b32.xlu1 %v2440_v26, %s2054_s26  ;;  %774 = vrot.lane.b32.xlu0 %v2495_v61, %s2047_s23 }
 0x15a   : > { %693 = vrot.lane.b32.xlu1 %v2448_v29, %s2048_s25  ;;  %1025 = vrot.lane.b32.xlu0 %v2495_v61, %s2049_s20 }
 0x15e   : > { %772 = vrot.lane.b32.xlu1 %v2448_v29, %s2047_s23  ;;  %1171 = vrot.lane.b32.xlu0 %v2495_v61, %s2054_s26 }
 0x162   : > { %1023 = vrot.lane.b32.xlu1 %v2448_v29, %s2049_s20  ;;  %1346 = vperm.xlu0 %1953, %v1336_v63   ;;  %v2570_v63 = vld [vmem:[%s3189_s5 + $0x8] sm:$0xff]  ;;  %s485_s20 = sand.u32 1, %s2027_s19  }
 0x163   : > { %v2589_v46 = vrot.slane %v2570_v63, %v738_v39  ;;  %v2602_v36 = vrot.slane %v2570_v63, %v811_v55  ;;  %v2616_v55 = vrot.slane %v2562_v41, %v884_v2  ;;  %s1722_s22 = scalar_lea.sflag [#allocation3], %s485_s20 }
 0x166   : > { %1169 = vrot.lane.b32.xlu1 %v2448_v29, %s2054_s26  ;;  %1236 = vrot.lane.b32.xlu0 %v2468_v53, %s2051_s18  ;;  %s1799_s26 = sshll.u32 %s485_s20, 4 }
 0x167   : > { %s487_s16 = scalar_lea.vmem [#allocation2], %s1799_s26 }
 0x168   : > { %s1736_s23 = sshll.u32 %s487_s16, 4  ;;  %s3144_s23 = int_to_ptr.vmem [resolvable:$true] %s1736_s23 }
 0x16a   : > { %839 = vrot.lane.b32.xlu1 %v2468_v53, %s2050_s27  ;;  %1244 = vrot.lane.b32.xlu0 %v2495_v61, %s2051_s18 }
 0x16c   : > { %v761_v10 = vpop.permute.xlu0 %760  ;;  %v682_v12 = vpop.permute.xlu1 %681 }
 0x16e   : > { %912 = vrot.lane.b32.xlu1 %v2468_v53, %s2052_s29  ;;  %1324 = vperm.xlu0 %1953, %v1306_v9  }
 0x170   : > { %v2544_v19 = vpop.permute.xlu0 %1011  ;;  %v834_v21 = vpop.permute.xlu1 %833 }
 0x172   : > { %1090 = vrot.lane.b32.xlu1 %v2468_v53, %s2053_s17  ;;  %1356 = vperm.xlu0 %1953, %v1338_v16   ;;  %v2578_v16 = vrot.slane %v2562_v41, %v738_v39  ;;  %v1135_v53 = vsub.s32 6, %v2548_v22 }
 0x174   : > { %v2550_v23 = vpop.permute.xlu0 %1230  ;;  %v2552_v24 = vpop.permute.xlu1 %906 }
 0x176   : > { %847 = vrot.lane.b32.xlu1 %v2495_v61, %s2050_s27 }
 0x178   : > { %v2565_v58 = vpop.permute.xlu1 %1084  ;;  %v690_v9 = vpop.permute.xlu0 %689 }
 0x179   : > { %v700_v43 = vsel %vm699_vm1, %v682_v12, %v690_v9  ;;  %v704_v57 = vsel %vm699_vm1, %v690_v9, %v682_v12 }
 0x17a   : > { %920 = vrot.lane.b32.xlu1 %v2495_v61, %s2052_s29  ;;  %v728_v8 = vmul.f32 %v711_v1, %v704_v57  ;;  %v729_v62 = vmul.f32 %v711_v1, %v700_v43  ;;  %v2638_v43 = vrot.slane %v2570_v63, %v957_v14  ;;  %s3142_s29 = scalar_lea.hbm %s3199_s15, %s1824_s30 }
 0x17c   : > { %v2599_v40 = vpop.permute.xlu1 %1157  ;;  %v769_v6 = vpop.permute.xlu0 %768  ;;  %v744_v37 = vmul.f32 %v2578_v16, %v728_v8 }
 0x17d   : > { %v777_v39 = vsel %vm776_vm2, %v761_v10, %v769_v6  ;;  %v781_v28 = vsel %vm776_vm2, %v769_v6, %v761_v10  ;;  %v2620_v10 = vrot.slane %v2570_v63, %v884_v2  ;;  %v2623_v6 = vrot.slane %v2562_v41, %v1062_v50 }
 0x17e   : > { %v801_v12 = vmul.f32 %v2312_v31, %v781_v28  ;;  %v802_v9 = vmul.f32 %v2312_v31, %v777_v39  ;;  %1098 = vrot.lane.b32.xlu1 %v2495_v61, %s2053_s17  ;;  %v2626_v28 = vrot.slane %v2570_v63, %v1062_v50  ;;  %v2630_v39 = vrot.slane %v2562_v41, %v957_v14 }
 0x17f   : > { %v2641_v50 = vrot.slane %v2562_v41, %v1135_v53 }
 0x180   : > { %v842_v5 = vpop.permute.xlu1 %841  ;;  %v1020_v31 = vpop.permute.xlu0 %1019  ;;  %v817_v1 = vmul.f32 %v2592_v59, %v801_v12  ;;  %v818_v61 = vmul.f32 %v2602_v36, %v802_v9 }
 0x181   : > { %v850_v57 = vsel %vm849_vm3, %v834_v21, %v842_v5  ;;  %v854_v2 = vsel %vm849_vm3, %v842_v5, %v834_v21  ;;  %v745_v5 = vmul.f32 %v2589_v46, %v729_v62  ;;  %v2652_v21 = vrot.slane %v2570_v63, %v1135_v53 }
 0x182   : > { %v874_v0 = vmul.f32 %v2350_v51, %v854_v2  ;;  %v875_v44 = vmul.f32 %v2350_v51, %v850_v57  ;;  %1234 = vrot.lane.b32.xlu1 %v2440_v26, %s2051_s18  ;;  %v1028_v51 = vsel %vm1027_vm4, %v2544_v19, %v1020_v31  ;;  %v1032_v9 = vsel %vm1027_vm4, %v1020_v31, %v2544_v19 }
 0x183   : > { %v826_v2 = vadd.f32 %v818_v61, %v745_v5  ;;  %v1052_v31 = vmul.f32 %v2326_v38, %v1028_v51  ;;  %v1053_v30 = vmul.f32 %v2326_v38, %v1032_v9  ;;  %v1305_v61 = vld [vmem:[%s3190_s6 + $0x10] sm:$0xff] }
 0x184   : > { %v890_v14 = vmul.f32 %v2616_v55, %v874_v0  ;;  %v891_v12 = vmul.f32 %v2620_v10, %v875_v44  ;;  %v915_v8 = vpop.permute.xlu1 %914  ;;  %v1093_v57 = vpop.permute.xlu0 %1092  ;;  %v1208_v44 = vsub.s32 7, %v2548_v22  ;;  %v825_v0 = vadd.f32 %v817_v1, %v744_v37 }
 0x185   : > { %v923_v62 = vsel %vm922_vm5, %v2552_v24, %v915_v8  ;;  %v927_v53 = vsel %vm922_vm5, %v915_v8, %v2552_v24  ;;  %v1101_v24 = vsel %vm1100_vm6, %v2565_v58, %v1093_v57  ;;  %v1105_v37 = vsel %vm1100_vm6, %v1093_v57, %v2565_v58 }
 0x186   : > { %v947_v26 = vmul.f32 %v2380_v7, %v927_v53  ;;  %v948_v19 = vmul.f32 %v2380_v7, %v923_v62  ;;  %1242 = vrot.lane.b32.xlu1 %v2448_v29, %s2051_s18  ;;  %v898_v7 = vadd.f32 %v890_v14, %v825_v0  ;;  %v899_v22 = vadd.f32 %v891_v12, %v826_v2  ;;  %s1973_s18 = scalar_lea.vmem %s3144_s23, 256 }
 0x187   : > { %v1125_v9 = vmul.f32 %v2434_v25, %v1101_v24  ;;  %v1126_v8 = vmul.f32 %v2434_v25, %v1105_v37  ;;  %v2700_v62 = vrot.slane %v2570_v63, %v1208_v44  ;;  %v1068_v53 = vmul.f32 %v2623_v6, %v1052_v31  ;;  %p1974_p11 = scmp.ne.s32.totalorder %s3144_s23, %s1973_s18 }
 0x188   : > { %v963_v1 = vmul.f32 %v2630_v39, %v947_v26  ;;  %v964_v5 = vmul.f32 %v2638_v43, %v948_v19  ;;  %v1166_v51 = vpop.permute.xlu1 %1165  ;;  %v1239_v38 = vpop.permute.xlu0 %1238  ;;  %v2697_v26 = vrot.slane %v2562_v41, %v1208_v44  ;;  %v1069_v25 = vmul.f32 %v2626_v28, %v1053_v30  ;;  %v1337_v41 = vld [vmem:[%s3191_s7 + $0x10] sm:$0xff] }
 0x189   : > { %v1174_v58 = vsel %vm1173_vm7, %v2599_v40, %v1166_v51  ;;  %v1178_v57 = vsel %vm1173_vm7, %v1166_v51, %v2599_v40  ;;  %v1247_v0 = vsel %vm1246_vm8, %v2550_v23, %v1239_v38  ;;  %v1251_v40 = vsel %vm1246_vm8, %v1239_v38, %v2550_v23  ;;  %p1975_p12 = pnand %p1974_p11, %p2176_p5 }
 0x18a   : > { %v971_v14 = vadd.f32 %v963_v1, %v898_v7  ;;  %v972_v12 = vadd.f32 %v964_v5, %v899_v22  ;;  %1319 = vperm.xlu1 %1954, %v1305_v61   ;;  %v1198_v2 = vmul.f32 %v2462_v52, %v1174_v58  ;;  %v1199_v30 = vmul.f32 %v2462_v52, %v1178_v57  ;;  %v2731_v52 = vld [vmem:[%s3189_s5 + $0x18] ss:$0 sm:$0xff] }
 0x18b   : > { %v1141_v24 = vmul.f32 %v2641_v50, %v1125_v9  ;;  %v1142_v37 = vmul.f32 %v2652_v21, %v1126_v8  ;;  %v1271_v7 = vmul.f32 %v2493_v60, %v1247_v0  ;;  %v1272_v22 = vmul.f32 %v2493_v60, %v1251_v40  ;;  %3259 = vst [vmem:[#allocation29_spill] sm:$0xff] %v2731_v52  ;;  %p1976_p13 = pneg %p1975_p12 }
 0x18c   : > { %v1003_v63 = vadd.f32 %v2575_v15, %v971_v14  ;;  %v1004_v44 = vadd.f32 %v2586_v45, %v972_v12  ;;  %v2717_v19 = vpop.permute.xlu0 %835  ;;  %v684_v31 = vpop.permute.xlu1 %683  ;;  %v2726_v45 = vld [vmem:[%s3189_s5 + $0x10] ss:$0 sm:$0xff]  ;;  %v1214_v5 = vmul.f32 %v2697_v26, %v1198_v2  ;;  %v1215_v51 = vmul.f32 %v2700_v62, %v1199_v30 }
 0x18d   : > { %v1287_v58 = vmul.f32 %v2726_v45, %v1271_v7  ;;  %v1288_v57 = vmul.f32 %v2731_v52, %v1272_v22 }
 0x18e   : > { %v1076_v23 = vadd.f32 %v1068_v53, %v1003_v63  ;;  %v1077_v61 = vadd.f32 %v1069_v25, %v1004_v44  ;;  %1351 = vperm.xlu1 %1954, %v1337_v41  }
 0x190   : > { %v1149_v15 = vadd.f32 %v1141_v24, %v1076_v23  ;;  %v1150_v1 = vadd.f32 %v1142_v37, %v1077_v61  ;;  %v909_v38 = vpop.permute.xlu0 %908  ;;  %v763_v9 = vpop.permute.xlu1 %762 }
 0x192   : > { %v1222_v60 = vadd.f32 %v1214_v5, %v1149_v15  ;;  %v1223_v8 = vadd.f32 %v1215_v51, %v1150_v1 }
 0x194   : > { %v1295_v14 = vadd.f32 %v1287_v58, %v1222_v60  ;;  %v1296_v12 = vadd.f32 %v1288_v57, %v1223_v8  ;;  %v2737_v53 = vpop.permute.xlu0 %1159  ;;  %v2739_v25 = vpop.permute.xlu1 %1013 }
 0x196   : > { %v1327_v0 = vmul.f32 %v2530_v4, %v1295_v14  ;;  %v1328_v40 = vmul.f32 %v2530_v4, %v1296_v12 }
 0x198   : > { %v2743_v41 = vpop.permute.xlu1 %1086  ;;  %v844_v63 = vpop.permute.xlu0 %843  ;;  %v2746_v44 = vadd.f32 %v2528_v3, %v1327_v0  ;;  %v2749_v2 = vadd.f32 %v2528_v3, %v1328_v40 }
 0x19a   : > { %3260 = vst [vmem:[#allocation30_spill] sm:$0xff] %v2746_v44  ;;  %3261 = vst [vmem:[#allocation31_spill] sm:$0xff] %v2749_v2  ;;  %v3226_v5 = vmax.f32 %v2746_v44, 0.0  ;;  %v3225_v51 = vmax.f32 %v2749_v2, 0.0 }
 0x19c   : > { %v2751_v30 = vpop.permute.xlu1 %1232  ;;  %v917_v24 = vpop.permute.xlu0 %916  ;;  %v1375_v57 = vadd.f32 %v3225_v51, %v3226_v5 }
 0x1a0   : > { %v1168_v37 = vpop.permute.xlu0 %1167  ;;  %v692_v23 = vpop.permute.xlu1 %691 }
 0x1a4   : > { %v771_v61 = vpop.permute.xlu1 %770  ;;  %v911_v7 = vpop.permute.xlu0 %910 }
 0x1a5   : > { %v778_v14 = vsel %vm776_vm2, %v763_v9, %v771_v61  ;;  %v782_v12 = vsel %vm776_vm2, %v771_v61, %v763_v9  ;;  %v851_v61 = vsel %vm849_vm3, %v2717_v19, %v844_v63 }
 0x1a6   : > { %v803_v44 = vmul.f32 %v2346_v49, %v782_v12  ;;  %v804_v51 = vmul.f32 %v2346_v49, %v778_v14 }
 0x1a8   : > { %v1022_v22 = vpop.permute.xlu1 %1021  ;;  %v2753_v15 = vpop.permute.xlu0 %845  ;;  %v820_v49 = vmul.f32 %v2602_v36, %v804_v51 }
 0x1ac   : > { %v1095_v4 = vpop.permute.xlu1 %1094  ;;  %v919_v1 = vpop.permute.xlu0 %918 }
 0x1ad   : > { %v2759_v3 = vsel %vm922_vm5, %v911_v7, %v919_v1  ;;  %v2763_v60 = vsel %vm922_vm5, %v919_v1, %v911_v7  ;;  %v701_v7 = vsel %vm699_vm1, %v684_v31, %v692_v23  ;;  %v705_v1 = vsel %vm699_vm1, %v692_v23, %v684_v31 }
 0x1ae   : > { %v730_v5 = vmul.f32 %v2342_v47, %v705_v1  ;;  %v731_v2 = vmul.f32 %v2342_v47, %v701_v7  ;;  %v855_v31 = vsel %vm849_vm3, %v844_v63, %v2717_v19  ;;  %v819_v23 = vmul.f32 %v2592_v59, %v803_v44 }
 0x1af   : > { %v876_v12 = vmul.f32 %v2316_v33, %v855_v31  ;;  %v877_v1 = vmul.f32 %v2316_v33, %v851_v61 }
 0x1b0   : > { %v2765_v8 = vpop.permute.xlu1 %1240  ;;  %v2767_v58 = vpop.permute.xlu0 %1096  ;;  %v746_v47 = vmul.f32 %v2578_v16, %v730_v5  ;;  %v747_v7 = vmul.f32 %v2589_v46, %v731_v2 }
 0x1b1   : > { %v892_v31 = vmul.f32 %v2616_v55, %v876_v12  ;;  %v893_v33 = vmul.f32 %v2620_v10, %v877_v1 }
 0x1b2   : > { %1376 = vadd.xlane.f32.xlu1 %v1375_v57  ;;  %v827_v19 = vadd.f32 %v819_v23, %v746_v47  ;;  %v828_v63 = vadd.f32 %v820_v49, %v747_v7  ;;  %v1029_v49 = vsel %vm1027_vm4, %v2739_v25, %v1022_v22  ;;  %v997_v47 = vmul.f32 %v2416_v17, %v2403_v13 }
 0x1b3   : > { %v998_v7 = vmul.f32 %v2416_v17, %v2422_v18 }
 0x1b4   : > { %v686_v0 = vpop.permute.xlu1 %685  ;;  %v2777_v40 = vpop.permute.xlu0 %687  ;;  %v900_v61 = vadd.f32 %v892_v31, %v827_v19  ;;  %v901_v29 = vadd.f32 %v893_v33, %v828_v63  ;;  %v1102_v63 = vsel %vm1100_vm6, %v2743_v41, %v1095_v4 }
 0x1b5   : > { %3262 = vst [vmem:[#allocation32_spill] sm:$0xff] %v2777_v40  ;;  %v924_v40 = vsel %vm922_vm5, %v909_v38, %v917_v24  ;;  %v1127_v31 = vmul.f32 %v2332_v42, %v1102_v63 }
 0x1b6   : > { %v950_v2 = vmul.f32 %v2320_v35, %v924_v40  ;;  %v1179_v40 = vsel %vm1173_vm7, %v1168_v37, %v2737_v53 }
 0x1b7   : > { %v1201_v13 = vmul.f32 %v2474_v54, %v1179_v40 }
 0x1b8   : > { %v2785_v57 = vpop.permute.xlu1 %764  ;;  %v2789_v9 = vpop.permute.xlu0 %766 }
 0x1b9   : > { %3263 = vst [vmem:[#allocation33_spill] sm:$0xff] %v2789_v9  ;;  %v928_v9 = vsel %vm922_vm5, %v917_v24, %v909_v38  ;;  %v966_v24 = vmul.f32 %v2638_v43, %v950_v2 }
 0x1ba   : > { %v949_v5 = vmul.f32 %v2320_v35, %v928_v9  ;;  %v1033_v9 = vsel %vm1027_vm4, %v1022_v22, %v2739_v25  ;;  %v1175_v35 = vsel %vm1173_vm7, %v2737_v53, %v1168_v37  ;;  %v1054_v25 = vmul.f32 %v2424_v20, %v1029_v49 }
 0x1bb   : > { %v974_v1 = vadd.f32 %v966_v24, %v901_v29  ;;  %v1055_v22 = vmul.f32 %v2424_v20, %v1033_v9  ;;  %v1106_v29 = vsel %vm1100_vm6, %v1095_v4, %v2743_v41  ;;  %v1200_v53 = vmul.f32 %v2474_v54, %v1175_v35 }
 0x1bc   : > { %v838_v14 = vpop.permute.xlu1 %837  ;;  %v2807_v44 = vpop.permute.xlu0 %1017  ;;  %v965_v38 = vmul.f32 %v2630_v39, %v949_v5  ;;  %v1128_v20 = vmul.f32 %v2332_v42, %v1106_v29  ;;  %v1070_v5 = vmul.f32 %v2623_v6, %v1054_v25  ;;  %v952_v42 = vmul.f32 %v2396_v11, %v2759_v3 }
 0x1bd   : > { %v1006_v17 = vadd.f32 %v998_v7, %v974_v1  ;;  %v1071_v2 = vmul.f32 %v2626_v28, %v1055_v22  ;;  %v1216_v54 = vmul.f32 %v2697_v26, %v1200_v53  ;;  %v852_v9 = vsel %vm849_vm3, %v838_v14, %v2753_v15 }
 0x1be   : > { %v973_v12 = vadd.f32 %v965_v38, %v900_v61  ;;  %v1217_v61 = vmul.f32 %v2700_v62, %v1201_v13  ;;  %v951_v38 = vmul.f32 %v2396_v11, %v2763_v60  ;;  %v1143_v35 = vmul.f32 %v2641_v50, %v1127_v31 }
 0x1bf   : > { %v1079_v49 = vadd.f32 %v1071_v2, %v1006_v17  ;;  %v1144_v40 = vmul.f32 %v2652_v21, %v1128_v20  ;;  %v1248_v11 = vsel %vm1246_vm8, %v2751_v30, %v2765_v8  ;;  %v1252_v3 = vsel %vm1246_vm8, %v2765_v8, %v2751_v30 }
 0x1c0   : > { %v2809_v51 = vpop.permute.xlu1 %1015  ;;  %v2819_v23 = vpop.permute.xlu0 %1163  ;;  %v1005_v37 = vadd.f32 %v997_v47, %v973_v12  ;;  %v879_v7 = vmul.f32 %v2318_v34, %v852_v9  ;;  %v967_v8 = vmul.f32 %v2630_v39, %v951_v38  ;;  %v968_v29 = vmul.f32 %v2638_v43, %v952_v42  ;;  %v3264_v9 = vld [vmem:[#allocation22_spill] sm:$0xff] }
 0x1c1   : > { %v1152_v30 = vadd.f32 %v1144_v40, %v1079_v49  ;;  %v1274_v31 = vmul.f32 %v2344_v48, %v1252_v3  ;;  %v3267_v3 = vld [vmem:[#allocation11_spill] sm:$0xff] }
 0x1c2   : > { %v1078_v24 = vadd.f32 %v1070_v5, %v1005_v37  ;;  %v895_v5 = vmul.f32 %v2620_v10, %v879_v7 }
 0x1c4   : > { %v2815_v52 = vpop.permute.xlu1 %1088  ;;  %v2849_v18 = vpop.permute.xlu0 %695  ;;  %v1151_v63 = vadd.f32 %v1143_v35, %v1078_v24  ;;  %v1225_v24 = vadd.f32 %v1217_v61, %v1152_v30 }
 0x1c6   : > { %v1224_v42 = vadd.f32 %v1216_v54, %v1151_v63 }
 0x1c8   : > { %v2837_v19 = vpop.permute.xlu1 %1161 }
 0x1cc   : > { %v694_v33 = vpop.permute.xlu1 %693 }
 0x1cd   : > { %v702_v41 = vsel %vm699_vm1, %v686_v0, %v694_v33  ;;  %v706_v4 = vsel %vm699_vm1, %v694_v33, %v686_v0  ;;  %v856_v0 = vsel %vm849_vm3, %v2753_v15, %v838_v14  ;;  %v2883_v15 = vpop.permute.xlu0 %774 }
 0x1ce   : > { %v732_v12 = vmul.f32 %v2352_v56, %v706_v4  ;;  %v733_v60 = vmul.f32 %v2352_v56, %v702_v41  ;;  %v878_v47 = vmul.f32 %v2318_v34, %v856_v0  ;;  %v1273_v34 = vmul.f32 %v2344_v48, %v1248_v11  ;;  %v3266_v11 = vld [vmem:[#allocation19_spill] sm:$0xff] }
 0x1cf   : > { %v1103_v4 = vsel %vm1100_vm6, %v2815_v52, %v2767_v58  ;;  %v1107_v48 = vsel %vm1100_vm6, %v2767_v58, %v2815_v52  ;;  %v3269_v58 = vld [vmem:[#allocation13_spill] sm:$0xff] }
 0x1d0   : > { %v773_v1 = vpop.permute.xlu1 %772  ;;  %v748_v53 = vmul.f32 %v2578_v16, %v732_v12  ;;  %v749_v13 = vmul.f32 %v2589_v46, %v733_v60  ;;  %v894_v33 = vmul.f32 %v2616_v55, %v878_v47  ;;  %v1289_v12 = vmul.f32 %v2726_v45, %v1273_v34  ;;  %v3265_v60 = vld [vmem:[#allocation29_spill] sm:$0xff] }
 0x1d1   : > { %v779_v14 = vsel %vm776_vm2, %v2785_v57, %v773_v1  ;;  %v783_v56 = vsel %vm776_vm2, %v773_v1, %v2785_v57  ;;  %v1026_v38 = vpop.permute.xlu0 %1025  ;;  %v1290_v1 = vmul.f32 %v3265_v60, %v1274_v31  ;;  %v1129_v54 = vmul.f32 %v3269_v58, %v1103_v4 }
 0x1d2   : > { %v805_v25 = vmul.f32 %v2314_v32, %v783_v56  ;;  %v806_v22 = vmul.f32 %v2314_v32, %v779_v14  ;;  %v999_v14 = vmul.f32 %v3267_v3, %v3266_v11  ;;  %v3268_v56 = vld [vmem:[#allocation21_spill] sm:$0xff]  ;;  %v1130_v61 = vmul.f32 %v3269_v58, %v1107_v48 }
 0x1d3   : > { %v1000_v52 = vmul.f32 %v3267_v3, %v3268_v56  ;;  %v3273_v11 = vld [vmem:[#allocation17_spill] sm:$0xff]  ;;  %v3274_v56 = vld [vmem:[#allocation16_spill] sm:$0xff] }
 0x1d4   : > { %v821_v57 = vmul.f32 %v2592_v59, %v805_v25  ;;  %v822_v37 = vmul.f32 %v2602_v36, %v806_v22  ;;  %v1024_v17 = vpop.permute.xlu1 %1023  ;;  %v1297_v25 = vadd.f32 %v1289_v12, %v1224_v42  ;;  %v1298_v22 = vadd.f32 %v1290_v1, %v1225_v24  ;;  %v3271_v42 = vld [vmem:[#allocation33_spill] sm:$0xff] }
 0x1d5   : > { %v1030_v32 = vsel %vm1027_vm4, %v2809_v51, %v1024_v17  ;;  %v1034_v20 = vsel %vm1027_vm4, %v1024_v17, %v2809_v51  ;;  %v1145_v17 = vmul.f32 %v2641_v50, %v1129_v54  ;;  %v1146_v34 = vmul.f32 %v2652_v21, %v1130_v61 }
 0x1d6   : > { %v829_v2 = vadd.f32 %v821_v57, %v748_v53  ;;  %v830_v41 = vadd.f32 %v822_v37, %v749_v13  ;;  %v1056_v0 = vmul.f32 %v3264_v9, %v1030_v32  ;;  %v1057_v35 = vmul.f32 %v3264_v9, %v1034_v20  ;;  %v1172_v37 = vpop.permute.xlu0 %1171 }
 0x1d7   : > { %v780_v24 = vsel %vm776_vm2, %v3271_v42, %v2883_v15 }
 0x1d8   : > { %v902_v51 = vadd.f32 %v894_v33, %v829_v2  ;;  %v903_v49 = vadd.f32 %v895_v5, %v830_v41  ;;  %v2921_v40 = vpop.permute.xlu1 %1169  ;;  %v1072_v53 = vmul.f32 %v2623_v6, %v1056_v0  ;;  %v1073_v13 = vmul.f32 %v2626_v28, %v1057_v35  ;;  %v3270_v33 = vld [vmem:[#allocation28_spill] sm:$0xff] }
 0x1da   : > { %v975_v47 = vadd.f32 %v967_v8, %v902_v51  ;;  %v976_v7 = vadd.f32 %v968_v29, %v903_v49  ;;  %v1329_v8 = vmul.f32 %v3270_v33, %v1297_v25  ;;  %v1330_v29 = vmul.f32 %v3270_v33, %v1298_v22  ;;  %v3272_v49 = vld [vmem:[#allocation32_spill] sm:$0xff]  ;;  %v3275_v22 = vld [vmem:[#allocation18_spill] sm:$0xff] }
 0x1db   : > { %v784_v51 = vsel %vm776_vm2, %v2883_v15, %v3271_v42  ;;  %v703_v9 = vsel %vm699_vm1, %v3272_v49, %v2849_v18  ;;  %v707_v0 = vsel %vm699_vm1, %v2849_v18, %v3272_v49 }
 0x1dc   : > { %v1007_v63 = vadd.f32 %v999_v14, %v975_v47  ;;  %v1008_v30 = vadd.f32 %v1000_v52, %v976_v7  ;;  %v840_v57 = vpop.permute.xlu1 %839  ;;  %v807_v3 = vmul.f32 %v3273_v11, %v784_v51  ;;  %v808_v14 = vmul.f32 %v3273_v11, %v780_v24  ;;  %v3280_v24 = vld [vmem:[#allocation12_spill] sm:$0xff] }
 0x1dd   : > { %v734_v52 = vmul.f32 %v3274_v56, %v707_v0  ;;  %v735_v58 = vmul.f32 %v3274_v56, %v703_v9  ;;  %v1177_v9 = vsel %vm1173_vm7, %v2819_v23, %v1172_v37  ;;  %v1181_v0 = vsel %vm1173_vm7, %v1172_v37, %v2819_v23 }
 0x1de   : > { %v1080_v31 = vadd.f32 %v1072_v53, %v1007_v63  ;;  %v1081_v32 = vadd.f32 %v1073_v13, %v1008_v30  ;;  %v823_v7 = vmul.f32 %v2592_v59, %v807_v3  ;;  %v824_v25 = vmul.f32 %v2602_v36, %v808_v14 }
 0x1df   : > { %v750_v53 = vmul.f32 %v2578_v16, %v734_v52  ;;  %v751_v13 = vmul.f32 %v2589_v46, %v735_v58 }
 0x1e0   : > { %v913_v20 = vpop.permute.xlu1 %912  ;;  %v2937_v5 = vadd.f32 %v1145_v17, %v1080_v31  ;;  %v2939_v2 = vadd.f32 %v1146_v34, %v1081_v32  ;;  %v1031_v17 = vsel %vm1027_vm4, %v2807_v44, %v1026_v38  ;;  %v3276_v31 = vld [vmem:[#allocation23_spill] sm:$0xff]  ;;  %v3277_v32 = vld [vmem:[#allocation20_spill] sm:$0xff] }
 0x1e1   : > { %v1347_v41 = vpop.permute.xlu0 %1346  ;;  %v1001_v33 = vmul.f32 %v3277_v32, %v3276_v31  ;;  %v832_v42 = vadd.f32 %v824_v25, %v751_v13  ;;  %v1058_v51 = vmul.f32 %v3280_v24, %v1031_v17  ;;  %v3282_v25 = vld [vmem:[#allocation26_spill] sm:$0xff] }
 0x1e2   : > { %v2941_v4 = vadd.f32 %v1347_v41, %v1329_v8  ;;  %v2943_v48 = vadd.f32 %v1347_v41, %v1330_v29  ;;  %v3278_v8 = vld [vmem:[#allocation25_spill] sm:$0xff]  ;;  %v831_v41 = vadd.f32 %v823_v7, %v750_v53  ;;  %v3283_v53 = vld [vmem:[#allocation15_spill] sm:$0xff] }
 0x1e3   : > { %v1002_v16 = vmul.f32 %v3277_v32, %v3278_v8 }
 0x1e4   : > { %v1369_v35 = vmax.f32 %v2941_v4, 0.0  ;;  %v1370_v12 = vmax.f32 %v2943_v48, 0.0  ;;  %v1091_v1 = vpop.permute.xlu1 %1090 }
 0x1e5   : > { %v1237_v54 = vpop.permute.xlu0 %1236 }
 0x1e6   : > { %v1378_v15 = vadd.f32 %v1370_v12, %v1369_v35 }
 0x1e8   : > { %v848_v18 = vpop.permute.xlu1 %847  ;;  %1379 = vadd.xlane.f32.xlu0 %v1378_v15 }
 0x1e9   : > { %v853_v61 = vsel %vm849_vm3, %v840_v57, %v848_v18  ;;  %v857_v47 = vsel %vm849_vm3, %v848_v18, %v840_v57  ;;  %v1035_v57 = vsel %vm1027_vm4, %v1026_v38, %v2807_v44  ;;  %v1245_v44 = vpop.permute.xlu0 %1244  ;;  %v3279_v38 = vld [vmem:[#allocation10_spill] sm:$0xff] }
 0x1ea   : > { %v880_v63 = vmul.f32 %v3275_v22, %v857_v47  ;;  %v881_v30 = vmul.f32 %v3275_v22, %v853_v61  ;;  %v1059_v49 = vmul.f32 %v3280_v24, %v1035_v57  ;;  %v1250_v56 = vsel %vm1246_vm8, %v1237_v54, %v1245_v44  ;;  %v3281_v61 = vld [vmem:[#allocation24_spill] sm:$0xff] }
 0x1eb   : > { %v1254_v52 = vsel %vm1246_vm8, %v1245_v44, %v1237_v54  ;;  %v1204_v22 = vmul.f32 %v3282_v25, %v1177_v9  ;;  %v1205_v54 = vmul.f32 %v3282_v25, %v1181_v0  ;;  %v1277_v13 = vmul.f32 %v3283_v53, %v1250_v56 }
 0x1ec   : > { %v896_v59 = vmul.f32 %v2616_v55, %v880_v63  ;;  %v897_v36 = vmul.f32 %v2620_v10, %v881_v30  ;;  %v921_v34 = vpop.permute.xlu1 %920  ;;  %v1075_v7 = vmul.f32 %v2626_v28, %v1059_v49 }
 0x1ed   : > { %v926_v46 = vsel %vm922_vm5, %v913_v20, %v921_v34  ;;  %v930_v29 = vsel %vm922_vm5, %v921_v34, %v913_v20  ;;  %v1220_v28 = vmul.f32 %v2697_v26, %v1204_v22  ;;  %v1221_v31 = vmul.f32 %v2700_v62, %v1205_v54  ;;  %v1325_v8 = vpop.permute.xlu0 %1324 }
 0x1ee   : > { %v953_v55 = vmul.f32 %v3279_v38, %v930_v29  ;;  %v954_v10 = vmul.f32 %v3279_v38, %v926_v46  ;;  %v904_v20 = vadd.f32 %v896_v59, %v831_v41  ;;  %v905_v11 = vadd.f32 %v897_v36, %v832_v42 }
 0x1ef   : > { %v1180_v38 = vsel %vm1173_vm7, %v2921_v40, %v2837_v19 }
 0x1f0   : > { %v969_v3 = vmul.f32 %v2630_v39, %v953_v55  ;;  %v970_v14 = vmul.f32 %v2638_v43, %v954_v10  ;;  %v1099_v15 = vpop.permute.xlu1 %1098  ;;  %v1074_v43 = vmul.f32 %v2623_v6, %v1058_v51  ;;  %v2055_v6 = vmov 0.0|0.0  }
 0x1f1   : > { %v1104_v58 = vsel %vm1100_vm6, %v1091_v1, %v1099_v15  ;;  %v1108_v18 = vsel %vm1100_vm6, %v1099_v15, %v1091_v1  ;;  %v1278_v1 = vmul.f32 %v3283_v53, %v1254_v52  ;;  %1854 = vmatprep.subr.bf16.mxu1 %v2055_v6  ;;  %v1357_v24 = vpop.permute.xlu0 %1356 }
 0x1f2   : > { %v977_v23 = vadd.f32 %v969_v3, %v904_v20  ;;  %v978_v37 = vadd.f32 %v970_v14, %v905_v11  ;;  %v1131_v47 = vmul.f32 %v3281_v61, %v1104_v58  ;;  %v1132_v39 = vmul.f32 %v3281_v61, %v1108_v18  ;;  %v3284_v20 = vld [vmem:[#allocation14_spill] sm:$0xff] }
 0x1f3   : > { %v1294_v46 = vmul.f32 %v3265_v60, %v1278_v1  ;;  %v1203_v3 = vmul.f32 %v3284_v20, %v1180_v38 }
 0x1f4   : > { %v1009_v63 = vadd.f32 %v1001_v33, %v977_v23  ;;  %v1010_v30 = vadd.f32 %v1002_v16, %v978_v37  ;;  %v1147_v17 = vmul.f32 %v2641_v50, %v1131_v47  ;;  %v1148_v36 = vmul.f32 %v2652_v21, %v1132_v39  ;;  %v1235_v34 = vpop.permute.xlu1 %1234 }
 0x1f5   : > { %v1293_v16 = vmul.f32 %v2726_v45, %v1277_v13  ;;  %v1176_v21 = vsel %vm1173_vm7, %v2837_v19, %v2921_v40  ;;  %v3285_v40 = vld [vmem:[#allocation27_spill] sm:$0xff]  ;;  %v1219_v58 = vmul.f32 %v2700_v62, %v1203_v3 }
 0x1f6   : > { %v1082_v57 = vadd.f32 %v1074_v43, %v1009_v63  ;;  %v1083_v59 = vadd.f32 %v1075_v7, %v1010_v30  ;;  %v1202_v11 = vmul.f32 %v3284_v20, %v1176_v21 }
 0x1f7   : > { %v1227_v61 = vadd.f32 %v1219_v58, %v2939_v2 }
 0x1f8   : > { %v1155_v32 = vadd.f32 %v1147_v17, %v1082_v57  ;;  %v1156_v33 = vadd.f32 %v1148_v36, %v1083_v59  ;;  %v1243_v44 = vpop.permute.xlu1 %1242  ;;  %v1218_v52 = vmul.f32 %v2697_v26, %v1202_v11 }
 0x1f9   : > { %v1249_v51 = vsel %vm1246_vm8, %v1235_v34, %v1243_v44  ;;  %v1253_v49 = vsel %vm1246_vm8, %v1243_v44, %v1235_v34  ;;  %v1392_v34 = vld [vmem:[%s3192_s8] sm:$0xff] }
 0x1fa   : > { %v1228_v29 = vadd.f32 %v1220_v28, %v1155_v32  ;;  %v1229_v50 = vadd.f32 %v1221_v31, %v1156_v33  ;;  %v1275_v15 = vmul.f32 %v3285_v40, %v1249_v51  ;;  %v1276_v56 = vmul.f32 %v3285_v40, %v1253_v49  ;;  %v1469_v28 = vld [vmem:[%s3194_s10] sm:$0xff] }
 0x1fb   : > { %v1226_v37 = vadd.f32 %v1218_v52, %v2937_v5  ;;  %v3286_v5 = vmov 0.0  }
 0x1fc   : > { %v1301_v41 = vadd.f32 %v1293_v16, %v1228_v29  ;;  %v1302_v42 = vadd.f32 %v1294_v46, %v1229_v50  ;;  %v1291_v18 = vmul.f32 %v2726_v45, %v1275_v15  ;;  %v1292_v23 = vmul.f32 %v3265_v60, %v1276_v56  ;;  %1843 = vmatprep.mubr.msk.f32.mxu1 %vm2056_vm9, %v3286_v5  ;;  %v1470_v16 = vld [vmem:[%s3194_s10 + $0x8] sm:$0xff]  ;;  %v1471_v46 = vld [vmem:[%s3194_s10 + $0x10] sm:$0xff]  ;;  %v1472_v29 = vld [vmem:[%s3194_s10 + $0x18] sm:$0xff] }
 0x1fd   : > { %v1474_v50 = vld [vmem:[%s3195_s11 + $0x8] sm:$0xff] }
 0x1fe   : > { %v1333_v55 = vmul.f32 %v1325_v8, %v1301_v41  ;;  %v1334_v10 = vmul.f32 %v1325_v8, %v1302_v42  ;;  %v1299_v39 = vadd.f32 %v1291_v18, %v1226_v37  ;;  %v1300_v43 = vadd.f32 %v1292_v23, %v1227_v61  ;;  %v1473_v41 = vld [vmem:[%s3195_s11] sm:$0xff] }
 0x200   : > { %v3043_v9 = vadd.f32 %v1357_v24, %v1333_v55  ;;  %v3045_v0 = vadd.f32 %v1357_v24, %v1334_v10  ;;  %v1476_v55 = vld [vmem:[%s3195_s11 + $0x18] sm:$0xff]  ;;  %v1475_v24 = vld [vmem:[%s3195_s11 + $0x10] sm:$0xff] }
 0x202   : > { %v1373_v14 = vmax.f32 %v3043_v9, 0.0  ;;  %v1374_v19 = vmax.f32 %v3045_v0, 0.0 }
 0x204   : > { %v1384_v27 = vadd.f32 %v1374_v19, %v1373_v14 }
 0x206   : > { %1385 = vadd.xlane.f32.xlu1 %v1384_v27 }
 0x209   : > { %v1320_v47 = vpop.permute.xlu1 %1319 }
 0x20a   : > { %v1331_v7 = vmul.f32 %v1320_v47, %v1299_v39  ;;  %v1332_v25 = vmul.f32 %v1320_v47, %v1300_v43 }
 0x20d   : > { %v1352_v22 = vpop.permute.xlu1 %1351 }
 0x20e   : > { %v3063_v54 = vadd.f32 %v1352_v22, %v1331_v7  ;;  %v3065_v26 = vadd.f32 %v1352_v22, %v1332_v25  ;;  %v1701_v25 = vld [vmem:[%s3197_s13] sm:$0xff] }
 0x20f   : > { %v1709_v22 = vld [vmem:[%s3198_s14] sm:$0xff] }
 0x210   : > { %v1371_v62 = vmax.f32 %v3063_v54, 0.0  ;;  %v1372_v45 = vmax.f32 %v3065_v26, 0.0  ;;  %v1626_v54 = vld [vmem:[%s3196_s12] sm:$0xff] }
 0x212   : > { %v1381_v60 = vadd.f32 %v1372_v45, %v1371_v62 }
 0x214   : > { %1382 = vadd.xlane.f32.xlu0 %v1381_v60 }
 0x23f   : > { %v1377_v2 = vpop.xlane.xlu1 %1376 }
 0x240   : > { %v1388_v30 = vmul.f32 0.00390625, %v1377_v2 }
 0x275   : > { %v1380_v63 = vpop.xlane.xlu0 %1379 }
 0x276   : > { %v1389_v53 = vmul.f32 0.00390625, %v1380_v63 }
 0x278   : > { %v1855_v13 = vpack.c.bf16 %v1389_v53, %v1388_v30  ;;  %v3287_v30 = vld [vmem:[#allocation30_spill] sm:$0xff] }
 0x279   : > { %v3288_v53 = vmax.f32 %v3287_v30, 0.0 }
 0x27a   : > { %1856 = vmatpush3.bf16.msra.mxu1 %v1855_v13 }
 0x27b   : > { %1857 = vmatprep.subr.bf16.mxu1 %v2055_v6  ;;  %v1393_v6 = vld [vmem:[%s3193_s9] sm:$0xff] }
 0x293   : > { %v1386_v1 = vpop.xlane.xlu1 %1385 }
 0x294   : > { %v1391_v57 = vmul.f32 0.00390625, %v1386_v1  ;;  %v3289_v1 = vld [vmem:[#allocation31_spill] sm:$0xff] }
 0x2a1   : > { %v1383_v17 = vpop.xlane.xlu0 %1382 }
 0x2a2   : > { %v1390_v59 = vmul.f32 0.00390625, %v1383_v17  ;;  %v3290_v17 = vmax.f32 %v3289_v1, 0.0 }
 0x2a4   : > { %v1858_v36 = vpack.c.bf16 %v1391_v57, %v1390_v59 }
 0x2a6   : > { %1859 = vmatpush3.bf16.msra.mxu1 %v1858_v36 }
 0x2a9   : > { %1844 = vmatmul.mubr.msk.f32.vlgmr.msra.gmra.mrb[0].mxu1 %vm1394_vm10, %v1392_v34 }
 0x2aa   : > { %1848 = vmatprep.mubr.msk.f32.mxu1 %vm499_vm0, %v1469_v28 }
 0x37c   : > { %v1464_v31 = vpop.f32.mrb[0].mxu1 }
 0x37d   : > { %v1465_v32 = vadd.f32 %v1464_v31, %v1393_v6  ;;  %v1845_v33 = vpop.f32.mrb[1].mxu1 }
 0x37e   : > { %v1971_v33 = vld [vmem:[%s2208_s24] sm:$0xff] }
 0x37f   : > { %v1468_v8 = vmax.f32 %v1465_v32, 0.0 }
 0x381   : > { %1846 = vmatprep.subr.mxu1 %v1468_v8 }
 0x382   : > { %1847 = vmatpush3.msra.mxu1 %v1468_v8 }
 0x383   : > { %1849 = vmatmul.mubr.msk.f32.vlgmr.msra.gmra.mrb[2].mxu1 %vm499_vm0, %v1470_v16  ;;  %v1972_v16 = vld [vmem:[%s2208_s24 + $0x8] sm:$0xff]  ;;  %s2057_s24 = smov [#allocation2]  }
 0x384   : > { %1851 = vmatprep.mubr.msk.f32.mxu1 %vm499_vm0, %v1471_v46  ;;  %s1977_s17 = sshll.u32 %s2057_s24, 4  ;;  %s1978_s17 = int_to_ptr.vmem [resolvable:$false] %s1977_s17 }
 0x385   : > { %s1979_s26 = scalar_lea.vmem %s1978_s17, 512  ;;  %p1980_p0 = scmp.lt.s32.totalorder %s3144_s23, %s1978_s17 }
 0x386   : > { %p1981_p1 = scmp.lt.s32.totalorder %s1979_s26, %s1973_s18 }
 0x387   : > { %1852 = vmatmul.mubr.msk.f32.gmra.mrb[4].mxu1 %vm499_vm0, %v1472_v29 }
 0x388   : > { %p1982_p2 = por %p1981_p1, %p1980_p0 }
 0x38a   : > { %p1983_p3 = pnand %p1982_p2, %p1976_p13 }
 0x456   : > { %v1850_v42 = vpop.f32.mrb[2].mxu1 }
 0x457   : > { %v1561_v44 = vadd.f32 %v1850_v42, %v1474_v50  ;;  %v1555_v21 = vpop.f32.mrb[3].mxu1 }
 0x458   : > { %v1556_v38 = vadd.f32 %v1555_v21, %v1473_v41 }
 0x459   : > { %v1814_v10 = vmul.f32 -1.442695, %v1561_v44 }
 0x45a   : > { %v1813_v51 = vmul.f32 -1.442695, %v1556_v38  ;;  %v1853_v49 = vpop.f32.mrb[4].mxu1 }
 0x45b   : > { %1955 = vpow2.f32 %v1814_v10  ;;  %v1571_v20 = vadd.f32 %v1853_v49, %v1476_v55  ;;  %v1565_v11 = vpop.f32.mrb[5].mxu1 }
 0x45c   : > { %1957 = vpow2.f32 %v1813_v51  ;;  %v1566_v3 = vadd.f32 %v1565_v11, %v1475_v24 }
 0x45d   : > { %v1816_v40 = vmul.f32 -1.442695, %v1571_v20 }
 0x45e   : > { %v1815_v15 = vmul.f32 -1.442695, %v1566_v3 }
 0x45f   : > { %1959 = vpow2.f32 %v1816_v40 }
 0x460   : > { %1961 = vpow2.f32 %v1815_v15 }
 0x465   : > { %v1956_v56 = vpop.eup %1955 }
 0x466   : > { %v1958_v27 = vpop.eup %1957  ;;  %v1587_v52 = vadd.f32 1.0, %v1956_v56 }
 0x467   : > { %v1586_v58 = vadd.f32 1.0, %v1958_v27 }
 0x468   : > { %1963 = vrcp.f32 %v1587_v52 }
 0x469   : > { %v1960_v18 = vpop.eup %1959  ;;  %1965 = vrcp.f32 %v1586_v58 }
 0x46a   : > { %v1962_v23 = vpop.eup %1961  ;;  %v1589_v37 = vadd.f32 1.0, %v1960_v18 }
 0x46b   : > { %v1588_v61 = vadd.f32 1.0, %v1962_v23 }
 0x46c   : > { %1967 = vrcp.f32 %v1589_v37 }
 0x46d   : > { %1969 = vrcp.f32 %v1588_v61 }
 0x472   : > { %v1964_v47 = vpop.eup %1963 }
 0x473   : > { %v1966_v39 = vpop.eup %1965  ;;  %1605 = vperm.xlu1 %1954, %v1964_v47  }
 0x474   : > { %1600 = vperm.xlu0 %1953, %v1966_v39  }
 0x476   : > { %v1968_v43 = vpop.eup %1967 }
 0x477   : > { %v1970_v7 = vpop.eup %1969 }
 0x478   : > { %1610 = vperm.xlu1 %1954, %v1970_v7   ;;  %1615 = vperm.xlu0 %1953, %v1968_v43  }
 0x47c   : > { %1704 = vperm.xlu1 %1954, %v1701_v25   ;;  %1712 = vperm.xlu0 %1953, %v1709_v22  }
 0x4f2   : > { %v1606_v60 = vpop.permute.xlu1 %1605 }
 0x4f3   : > { %v1620_v5 = vmul.f32 %v1606_v60, %v1369_v35  ;;  %v1621_v2 = vmul.f32 %v1606_v60, %v1370_v12  ;;  %v1601_v63 = vpop.permute.xlu0 %1600 }
 0x4f4   : > { %v1618_v13 = vmul.f32 %v1601_v63, %v3288_v53  ;;  %v1619_v57 = vmul.f32 %v1601_v63, %v3290_v17 }
 0x4f6   : > { %v1860_v59 = vpack.c.bf16 %v1621_v2, %v1619_v57  ;;  %v1862_v36 = vpack.c.bf16 %v1620_v5, %v1618_v13 }
 0x4f7   : > { %v1611_v34 = vpop.permute.xlu1 %1610  ;;  %v1616_v28 = vpop.permute.xlu0 %1615 }
 0x4f8   : > { %v1622_v6 = vmul.f32 %v1611_v34, %v1371_v62  ;;  %v1623_v4 = vmul.f32 %v1611_v34, %v1372_v45  ;;  %v1624_v48 = vmul.f32 %v1616_v28, %v1373_v14  ;;  %v1625_v35 = vmul.f32 %v1616_v28, %v1374_v19  ;;  %1861 = vmatprep.subr.bf16.mxu0 %v1860_v59 }
 0x4f9   : > { %1863 = vmatpush1.bf16.msra.mxu0 %v1862_v36 }
 0x4fa   : > { %v1864_v12 = vpack.c.bf16 %v1625_v35, %v1623_v4  ;;  %v1866_v31 = vpack.c.bf16 %v1624_v48, %v1622_v6 }
 0x4fb   : > { %v1705_v9 = vpop.permute.xlu1 %1704  ;;  %v1713_v26 = vpop.permute.xlu0 %1712 }
 0x4fc   : > { %1865 = vmatprep.subr.bf16.mxu0 %v1864_v12 }
 0x4fd   : > { %1867 = vmatpush1.bf16.msra.mxu0 %v1866_v31 }
 0x500   : > { %1817 = vmatmul.mubr.msk.f32.vlgmr.msra.gmra.mrb[8].mxu0 %vm1394_vm10, %v1626_v54 }
 0x5d3   : > { %v1696_v0 = vpop.f32.mrb[8].mxu0 }
 0x5d4   : > { %v1707_v14 = vmul.f32 %v1705_v9, %v1696_v0  ;;  %v1698_v19 = vpop.f32.mrb[9].mxu0 }
 0x5d5   : > { %v1708_v62 = vmul.f32 %v1705_v9, %v1698_v19 }
 0x5d6   : > { %v1715_v45 = vadd.f32 %v1713_v26, %v1707_v14 }
 0x5d7   : > { %v1716_v32 = vadd.f32 %v1713_v26, %v1708_v62 }
 0x5d8   : > { %v1717_v8 = vadd.f32 %v1971_v33, %v1715_v45 }
 0x5d9   : > { %v1718_v46 = vadd.f32 %v1972_v16, %v1716_v32 }
 0x5da   : > { %1719 = vst [vmem:[%s487_s16] sm:$0xff] %v1717_v8 }
 0x5db   : > { %1720 = vst [vmem:[%s487_s16 + $0x8] sm:$0xff] %v1718_v46 }
 0x5dc   : > { %1986 = shalt.err (!%p1983_p3)
}
 0x5dd   : > { %s1987_s20 = scalar_lea.hbm %s3142_s29, 256  ;;  %s1991_s25 = scalar_lea.hbm %s3199_s15, 512 }
 0x5de   : > { %p1988_p4 = scmp.ne.s32.totalorder %s3142_s29, %s1987_s20  ;;  %p1992_p9 = scmp.lt.u32.totalorder %s3142_s29, %s3199_s15 }
 0x5df   : > { %p1993_p10 = scmp.lt.u32.totalorder %s1991_s25, %s1987_s20  ;;  %p1995_p12 = scmp.lt.u32.totalorder %s1987_s20, %s3142_s29 }
 0x5e0   : > { %p1989_p7 = pnand %p1988_p4, %p2176_p5 }
 0x5e1   : > { %p1994_p11 = por %p1993_p10, %p1992_p9 }
 0x5e2   : > { %p1990_p8 = pneg %p1989_p7 }
 0x5e3   : > { %p1996_p13 = por %p1995_p12, %p1994_p11 }
 0x5e5   : > { %p1997_p0 = pnand %p1996_p13, %p1990_p8 }
 0x5e7   : > { %2000 = shalt.err (!%p1997_p0)
}
 0x5e8   : > { %1868 = dma.vmem_to_hbm [thread:$0]  (%p2176_p5), %s3144_s23, 256, %s3142_s29, %s1722_s22  }
 0x5e9 PF: > { %s3291_s18 = sld [smem:[#allocation5_spill]]  ;;  %p1874_p1 = scmp.ge.s32.totalorder %s2035_s21, 2 }
 0x5eb   : > { %p1871_p2 = pnand %p1874_p1, %p2180_p6 }
 0x5ef   : > { %s1748_s26 = sand.u32 1, %s3291_s18  }
 0x5f0   : > { %s1749_s30 = scalar_lea.sflag [#allocation3], %s1748_s26 }
 0x5f1   : > { %2018 = dma.done.wait (!%p1871_p2), %s1749_s30, 256  }
 0x5f2   : > { %2020 = vsyncadd (!%p1871_p2), %s1749_s30, 4294967040  ;;  %s3293_s21 = sld [smem:[#allocation7_spill]]  ;;  %s3294_s20 = sld [smem:[#allocation6_spill]] }
 0x5f3   : > { %s3295_s16 = sld [smem:[#allocation8_spill]]  ;;  %s3296_s18 = smov %s2027_s19 }
 0x5f8   : > { %p25_p3 = scmp.ge.s32.totalorder %s3293_s21, 4   ;;  %s3297_s19 = smov %s3294_s20 }
 0x5f9   : > { %s3298_s20 = smov %s3295_s16 }
 0x5fa   :  { %27 = sbr.rel (!%p25_p3) target bundleno = 3 (0x3), region = 115 }
 0x601   :  { %1754 = vsyncpa [#allocation3], 1 }
 0x602   :  { %1756 = vsyncpa [#allocation3 + $0x1], 1 }

</bundles_post_ra>
